<compile_context>
chip_gen: v7x
topology: tpu7x:2x2x1
jax: 0.10.0
libtpu: 0.0.40
codegen_flags: <defaults>
</compile_context>

<pallas_src>
import math

import jax
import jax.numpy as jnp
from jax import lax
from jax.experimental import pallas as pl
from jax.experimental.pallas import tpu as pltpu


# ----------------------------- "config" ------------------------------------
# (PtConfig fields the forward pass actually uses; non-hard / non-cpd path.)
DIM_Z = 32           # config.dim_z  (embed dim)
NUM_CHANNELS = 4     # config.num_channels
TERNARY_RANK = 8     # config.ternary_rank
DIM_G = 16           # config.dim_g
CR = NUM_CHANNELS * TERNARY_RANK

TERNARY_SCALE = 1.0 / math.sqrt(DIM_Z)   # config.ternary_factor_scaling
BINARY_SCALE = 1.0 / math.sqrt(DIM_Z)    # config.binary_factor_scaling
REG_H = 4.0                              # config.regularize_h
REG_G = 2.0                              # config.regularize_g
REG_Z = 2.0                              # config.regularize_z
INV_REG_H = 1.0 / REG_H                  # exact (power of two)
INV_REG_G = 1.0 / REG_G
INV_REG_Z = 1.0 / REG_Z
TERNARY_INIT = 0.02                      # config.ternary_initializer_range
BINARY_INIT = 0.02                       # config.binary_initializer_range


def _softmax_last(x):
    m = jnp.max(x, axis=-1, keepdims=True)
    e = jnp.exp(x - m)
    # approx reciprocal -> EUP slot (otherwise idle), instead of VALU divide.
    return e * pl.reciprocal(jnp.sum(e, axis=-1, keepdims=True), approx=True)


def _dot_t(a, b):
    # a @ b.T without materializing the transpose: contract last dims.
    return lax.dot_general(a, b, (((1,), (1,)), ((), ())),
                           preferred_element_type=jnp.float32)


def _dot_ta(a, b):
    # a.T @ b without materializing the transpose: contract first dims.
    return lax.dot_general(a, b, (((0,), (0,)), ((), ())),
                           preferred_element_type=jnp.float32)


def pt_encoder_iterator_kernel(unary_ref, qz_ref, mask_ref,
                               u_ref, v_ref, bfac_ref,
                               qz_out_ref, qh_out_ref):
    """TB batch elements per grid step.

    unary_ref, qz_ref : (TB*S, D)   (batch/seq pre-flattened in the wrapper)
    mask_ref          : (TB, 1, S, S)
    u_ref, v_ref      : (C*R, D)
    bfac_ref          : (G, D)
    qz_out_ref        : (TB*S, D)
    qh_out_ref        : (TB, C, S, S)
    """
    TB = mask_ref.shape[0]
    S = mask_ref.shape[2]
    R = TERNARY_RANK
    C = NUM_CHANNELS
    D = qz_ref.shape[1]

    qz_in = qz_ref[...].astype(jnp.float32)        # (M, D)
    unary = unary_ref[...].astype(jnp.float32)     # (M, D)
    old_qz = qz_in

    # --- self.norm = Softmax(dim=-1) over all TB*S rows ---------------------
    qz = _softmax_last(qz_in)                      # (M, D)

    u_w = u_ref[...].astype(jnp.float32)           # (CR, D)
    v_w = v_ref[...].astype(jnp.float32)           # (CR, D)
    bfac = bfac_ref[...].astype(jnp.float32)       # (G, D)

    # --- PtTopicModeling over all TB*S rows at once --------------------------
    qg = _softmax_last(_dot_t(qz, bfac) * (BINARY_SCALE * INV_REG_G))   # (M, G)
    m2 = jnp.dot(qg, bfac, preferred_element_type=jnp.float32) * BINARY_SCALE

    # --- PtHeadSelection: per-channel projections (weights sliced on sublane
    #     axis -> free static views; matmuls span all TB*S rows) --------------
    u_projs, v_projs, v_dot_u, u_dot_v = [], [], [], []
    for c in range(C):
        lo = c * R
        U_c = u_w[lo:lo + R, :]                    # (R, D) sublane slice
        V_c = v_w[lo:lo + R, :]                    # (R, D)
        u_p = _dot_t(qz, U_c) * TERNARY_SCALE      # (M, R)
        v_p = _dot_t(qz, V_c) * TERNARY_SCALE      # (M, R)
        u_projs.append(u_p)
        v_projs.append(v_p)
        # reassociation: (qh @ v_p) @ U_c == qh @ (v_p @ U_c)
        v_dot_u.append(jnp.dot(v_p, U_c, preferred_element_type=jnp.float32))  # (M, D)
        u_dot_v.append(jnp.dot(u_p, V_c, preferred_element_type=jnp.float32))  # (M, D)

    # --- per-batch S x S sigmoid attention + message reassembly --------------
    for b in range(TB):
        r0, r1 = b * S, (b + 1) * S                # sublane-aligned static rows
        mask_b = mask_ref[b, 0].astype(jnp.float32)        # (S, S)
        m1_b = jnp.zeros((S, D), jnp.float32)
        for c in range(C):
            u_bc = u_projs[c][r0:r1, :]            # (S, R)
            v_bc = v_projs[c][r0:r1, :]            # (S, R)
            f = _dot_t(u_bc, v_bc) + mask_b        # message_F + dependency_mask
            qh = jax.nn.sigmoid(f * INV_REG_H)     # (S, S), sigmoid -> EUP
            qh_out_ref[b, c] = qh.astype(qh_out_ref.dtype)
            # (qh @ v_bc) @ U_c  ==  qh @ (v_bc @ U_c)
            m1_b = m1_b + jnp.dot(qh, v_dot_u[c][r0:r1, :],
                                  preferred_element_type=jnp.float32)
            # (qh.T @ u_bc) @ V_c == qh.T @ (u_bc @ V_c); transpose folded by
            # contracting dim 0 of qh (no XLU vxpose).
            m1_b = m1_b + _dot_ta(qh, u_dot_v[c][r0:r1, :])
        m1_b = m1_b * TERNARY_SCALE

        # --- iterator update --------------------------------------------------
        new_qz_b = ((m1_b + m2[r0:r1, :] + unary[r0:r1, :]) * INV_REG_Z
                    + old_qz[r0:r1, :]) * 0.5
        qz_out_ref[r0:r1, :] = new_qz_b.astype(qz_out_ref.dtype)


def _pick_tb(B, S, target_rows=256):
    """Batch elements per grid step: smallest divisor of B giving >= target_rows
    sublane rows per block (fills MXU rows, amortizes per-step overhead),
    subject to the (8,128) block constraint on the flattened (TB*S, D) block."""
    candidates = [tb for tb in range(1, B + 1) if B % tb == 0]
    for tb in candidates:
        if ((tb * S) % 8 == 0 or tb == B) and tb * S >= target_rows:
            return tb
    legal = [tb for tb in candidates if (tb * S) % 8 == 0 or tb == B]
    return legal[-1]


def pt_encoder_iterator(unary_potentials, qz, dependency_mask,
                        ternary_u, ternary_v, binary_factor):
    B, S, D = qz.shape
    G = binary_factor.shape[0]
    TB = _pick_tb(B, S)
    grid = (B // TB,)

    # Flatten batch/seq in the wrapper (free metadata reshape in XLA) so the
    # kernel sees lane/sublane-friendly 2-D activation blocks.
    qz2 = qz.reshape(B * S, D)
    unary2 = unary_potentials.reshape(B * S, D)

    grid_spec = pltpu.PrefetchScalarGridSpec(
        num_scalar_prefetch=0,
        grid=grid,
        in_specs=[
            pl.BlockSpec((TB * S, D), lambda b: (b, 0)),           # unary (flat)
            pl.BlockSpec((TB * S, D), lambda b: (b, 0)),           # qz (flat)
            pl.BlockSpec((TB, 1, S, S), lambda b: (b, 0, 0, 0)),   # mask
            pl.BlockSpec((CR, D), lambda b: (0, 0)),               # U
            pl.BlockSpec((CR, D), lambda b: (0, 0)),               # V
            pl.BlockSpec((G, D), lambda b: (0, 0)),                # binary factor
        ],
        out_specs=[
            pl.BlockSpec((TB * S, D), lambda b: (b, 0)),                     # qz out
            pl.BlockSpec((TB, NUM_CHANNELS, S, S), lambda b: (b, 0, 0, 0)),  # qh out
        ],
    )

    # Advisory cost estimate so XLA schedules surrounding ops sensibly.
    flops = B * (
        4 * S * D * CR            # u/v projections
        + 4 * S * CR * D          # v@U / u@V precomputes
        + NUM_CHANNELS * 2 * S * S * TERNARY_RANK   # attention logits
        + NUM_CHANNELS * 4 * S * S * D              # qh-stage matmuls
        + 4 * S * D * G           # topic modeling
    )
    transcendentals = B * (S * D + S * G + NUM_CHANNELS * S * S)
    bytes_accessed = 4 * (3 * B * S * D + B * S * S
                          + B * NUM_CHANNELS * S * S + 2 * CR * D + G * D)

    qz_out2, qh_out = pl.pallas_call(
        pt_encoder_iterator_kernel,
        grid_spec=grid_spec,
        out_shape=(
            jax.ShapeDtypeStruct((B * S, D), qz.dtype),
            jax.ShapeDtypeStruct((B, NUM_CHANNELS, S, S), qz.dtype),
        ),
        compiler_params=pltpu.CompilerParams(
            dimension_semantics=("parallel",),
            vmem_limit_bytes=48 * 1024 * 1024),
        cost_estimate=pl.CostEstimate(flops=flops,
                                      transcendentals=transcendentals,
                                      bytes_accessed=bytes_accessed),
    )(unary2, qz2, dependency_mask, ternary_u, ternary_v, binary_factor)

    return qz_out2.reshape(B, S, D), qh_out


# ------------------------- pure-JAX reference -------------------------------
def reference(unary, qz, mask, u_w, v_w, bfac):
    old_qz = qz
    qzn = jax.nn.softmax(qz, axis=-1)
    qz_u = qzn @ u_w.T * TERNARY_SCALE
    qz_v = qzn @ v_w.T * TERNARY_SCALE
    B, S, _ = qz.shape
    qz_u4 = qz_u.reshape(B, S, NUM_CHANNELS, TERNARY_RANK).transpose(0, 2, 1, 3)
    qz_v4 = qz_v.reshape(B, S, NUM_CHANNELS, TERNARY_RANK).transpose(0, 2, 1, 3)
    msg_f = jnp.einsum('bcsr,bctr->bcst', qz_u4, qz_v4) + mask
    qh = jax.nn.sigmoid(msg_f / REG_H)
    qh_v1 = jnp.einsum('bcst,bctr->bcsr', qh, qz_v4)
    qh_v2 = jnp.einsum('bcts,bctr->bcsr', qh, qz_u4)
    qh_v1 = qh_v1.transpose(0, 2, 1, 3).reshape(B, S, CR)
    qh_v2 = qh_v2.transpose(0, 2, 1, 3).reshape(B, S, CR)
    m1 = (qh_v1 @ u_w + qh_v2 @ v_w) * TERNARY_SCALE
    qg = qzn @ bfac.T * BINARY_SCALE
    qg = jax.nn.softmax(qg / REG_G, axis=-1)
    m2 = qg @ bfac * BINARY_SCALE
    new_qz = (m1 + m2 + unary) / REG_Z
    new_qz = (new_qz + old_qz) * 0.5
    return new_qz, qh


if __name__ == "__main__":
    key = jax.random.PRNGKey(0)
    kq, ku, kw1, kw2, kw3 = jax.random.split(key, 5)

    B, S, D = 2, 8, DIM_Z
    qz = jax.random.normal(kq, (B, S, D), dtype=jnp.float32)
    unary = jax.random.normal(ku, (B, S, D), dtype=jnp.float32)
    dependency_mask = jnp.zeros((B, 1, S, S), dtype=jnp.float32)

    # deterministic parameter init (matching nn.init.normal_ shapes/std)
    ternary_u = TERNARY_INIT * jax.random.normal(kw1, (CR, D), dtype=jnp.float32)
    ternary_v = TERNARY_INIT * jax.random.normal(kw2, (CR, D), dtype=jnp.float32)
    binary_factor = BINARY_INIT * jax.random.normal(kw3, (DIM_G, D),
                                                    dtype=jnp.float32)

    qz_out, qh_out = pt_encoder_iterator(unary, qz, dependency_mask,
                                         ternary_u, ternary_v, binary_factor)
    jax.block_until_ready((qz_out, qh_out))

    qz_ref, qh_ref = reference(unary, qz, dependency_mask,
                               ternary_u, ternary_v, binary_factor)
    assert jnp.allclose(qz_out, qz_ref, rtol=1e-4, atol=1e-4), "qz mismatch"
    assert jnp.allclose(qh_out, qh_ref, rtol=1e-4, atol=1e-4), "qh mismatch"

    print("KERNEL_OK")
</pallas_src>

<mosaic_0001>
module attributes {stable_mosaic.version = 11 : i64} {
  func.func @pt_encoder_iterator_kernel(%arg0: i32, %arg1: memref<16x32xf32, #tpu.memory_space<vmem>>, %arg2: memref<16x32xf32, #tpu.memory_space<vmem>>, %arg3: memref<2x1x8x8xf32, #tpu.memory_space<vmem>>, %arg4: memref<32x32xf32, #tpu.memory_space<vmem>>, %arg5: memref<32x32xf32, #tpu.memory_space<vmem>>, %arg6: memref<16x32xf32, #tpu.memory_space<vmem>>, %arg7: memref<16x32xf32, #tpu.memory_space<vmem>>, %arg8: memref<2x4x8x8xf32, #tpu.memory_space<vmem>>) attributes {dimension_semantics = [#tpu.dimension_semantics<parallel>], iteration_bounds = array<i64: 1>, scalar_prefetch = 0 : i64, scratch_operands = 0 : i64, tpu.core_type = #tpu.core_type<tc>, window_params = [{transform_indices = @transform_0, window_bounds = array<i64: 16, 32>}, {transform_indices = @transform_1, window_bounds = array<i64: 16, 32>}, {transform_indices = @transform_2, window_bounds = array<i64: 2, 1, 8, 8>}, {pipeline_mode = #tpu.pipeline_mode<synchronous>, transform_indices = @transform_3, window_bounds = array<i64: 32, 32>}, {pipeline_mode = #tpu.pipeline_mode<synchronous>, transform_indices = @transform_4, window_bounds = array<i64: 32, 32>}, {pipeline_mode = #tpu.pipeline_mode<synchronous>, transform_indices = @transform_5, window_bounds = array<i64: 16, 32>}, {transform_indices = @transform_6, window_bounds = array<i64: 16, 32>}, {transform_indices = @transform_7, window_bounds = array<i64: 2, 4, 8, 8>}]} {
    %c0 = arith.constant 0 : index
    %c0_0 = arith.constant 0 : index
    %0 = vector.load %arg2[%c0, %c0_0] : memref<16x32xf32, #tpu.memory_space<vmem>>, vector<16x32xf32>
    %c0_1 = arith.constant 0 : index
    %c0_2 = arith.constant 0 : index
    %1 = vector.load %arg1[%c0_1, %c0_2] : memref<16x32xf32, #tpu.memory_space<vmem>>, vector<16x32xf32>
    %cst = arith.constant dense<0xFF800000> : vector<16xf32>
    %2 = vector.multi_reduction <maximumf>, %0, %cst [1] : vector<16x32xf32> to vector<16xf32>
    %3 = vector.shape_cast %2 : vector<16xf32> to vector<16x1xf32>
    %4 = vector.broadcast %3 : vector<16x1xf32> to vector<16x32xf32>
    %5 = arith.subf %0, %4 : vector<16x32xf32>
    %6 = math.exp %5 : vector<16x32xf32>
    %cst_3 = arith.constant dense<0.000000e+00> : vector<16xf32>
    %7 = vector.multi_reduction <add>, %6, %cst_3 [1] : vector<16x32xf32> to vector<16xf32>
    %8 = vector.shape_cast %7 : vector<16xf32> to vector<16x1xf32>
    %9 = tpu.reciprocal %8 {approx = true} : vector<16x1xf32> -> vector<16x1xf32>
    %10 = vector.broadcast %9 : vector<16x1xf32> to vector<16x32xf32>
    %11 = arith.mulf %6, %10 : vector<16x32xf32>
    %c0_4 = arith.constant 0 : index
    %c0_5 = arith.constant 0 : index
    %12 = vector.load %arg4[%c0_4, %c0_5] : memref<32x32xf32, #tpu.memory_space<vmem>>, vector<32x32xf32>
    %c0_6 = arith.constant 0 : index
    %c0_7 = arith.constant 0 : index
    %13 = vector.load %arg5[%c0_6, %c0_7] : memref<32x32xf32, #tpu.memory_space<vmem>>, vector<32x32xf32>
    %c0_8 = arith.constant 0 : index
    %c0_9 = arith.constant 0 : index
    %14 = vector.load %arg6[%c0_8, %c0_9] : memref<16x32xf32, #tpu.memory_space<vmem>>, vector<16x32xf32>
    %cst_10 = arith.constant dense<0.000000e+00> : vector<16x16xf32>
    %15 = tpu.matmul %11, %14, %cst_10 {dimension_numbers = #tpu.dot_dimension_numbers<[1], [1], [0], [0], [0, 0, 1, 0], [], []>} : vector<16x32xf32>, vector<16x32xf32>, vector<16x16xf32> -> vector<16x16xf32>
    %cst_11 = arith.constant 0.0883883461 : f32
    %16 = vector.broadcast %cst_11 : f32 to vector<16x16xf32>
    %17 = arith.mulf %15, %16 : vector<16x16xf32>
    %cst_12 = arith.constant dense<0xFF800000> : vector<16xf32>
    %18 = vector.multi_reduction <maximumf>, %17, %cst_12 [1] : vector<16x16xf32> to vector<16xf32>
    %19 = vector.shape_cast %18 : vector<16xf32> to vector<16x1xf32>
    %20 = vector.broadcast %19 : vector<16x1xf32> to vector<16x16xf32>
    %21 = arith.subf %17, %20 : vector<16x16xf32>
    %22 = math.exp %21 : vector<16x16xf32>
    %cst_13 = arith.constant dense<0.000000e+00> : vector<16xf32>
    %23 = vector.multi_reduction <add>, %22, %cst_13 [1] : vector<16x16xf32> to vector<16xf32>
    %24 = vector.shape_cast %23 : vector<16xf32> to vector<16x1xf32>
    %25 = tpu.reciprocal %24 {approx = true} : vector<16x1xf32> -> vector<16x1xf32>
    %26 = vector.broadcast %25 : vector<16x1xf32> to vector<16x16xf32>
    %27 = arith.mulf %22, %26 : vector<16x16xf32>
    %cst_14 = arith.constant dense<0.000000e+00> : vector<16x32xf32>
    %28 = tpu.matmul %27, %14, %cst_14 {dimension_numbers = #tpu.dot_dimension_numbers<[1], [0], [0], [1], [0, 0, 1, 1], [], []>} : vector<16x16xf32>, vector<16x32xf32>, vector<16x32xf32> -> vector<16x32xf32>
    %cst_15 = arith.constant 0.176776692 : f32
    %29 = vector.broadcast %cst_15 : f32 to vector<16x32xf32>
    %30 = arith.mulf %28, %29 : vector<16x32xf32>
    %31 = vector.extract_strided_slice %12 {offsets = [0, 0], sizes = [8, 32], strides = [1, 1]} : vector<32x32xf32> to vector<8x32xf32>
    %32 = vector.extract_strided_slice %13 {offsets = [0, 0], sizes = [8, 32], strides = [1, 1]} : vector<32x32xf32> to vector<8x32xf32>
    %cst_16 = arith.constant dense<0.000000e+00> : vector<16x8xf32>
    %33 = tpu.matmul %11, %31, %cst_16 {dimension_numbers = #tpu.dot_dimension_numbers<[1], [1], [0], [0], [0, 0, 1, 0], [], []>} : vector<16x32xf32>, vector<8x32xf32>, vector<16x8xf32> -> vector<16x8xf32>
    %cst_17 = arith.constant 0.176776692 : f32
    %34 = vector.broadcast %cst_17 : f32 to vector<16x8xf32>
    %35 = arith.mulf %33, %34 : vector<16x8xf32>
    %cst_18 = arith.constant dense<0.000000e+00> : vector<16x8xf32>
    %36 = tpu.matmul %11, %32, %cst_18 {dimension_numbers = #tpu.dot_dimension_numbers<[1], [1], [0], [0], [0, 0, 1, 0], [], []>} : vector<16x32xf32>, vector<8x32xf32>, vector<16x8xf32> -> vector<16x8xf32>
    %cst_19 = arith.constant 0.176776692 : f32
    %37 = vector.broadcast %cst_19 : f32 to vector<16x8xf32>
    %38 = arith.mulf %36, %37 : vector<16x8xf32>
    %cst_20 = arith.constant dense<0.000000e+00> : vector<16x32xf32>
    %39 = tpu.matmul %38, %31, %cst_20 {dimension_numbers = #tpu.dot_dimension_numbers<[1], [0], [0], [1], [0, 0, 1, 1], [], []>} : vector<16x8xf32>, vector<8x32xf32>, vector<16x32xf32> -> vector<16x32xf32>
    %cst_21 = arith.constant dense<0.000000e+00> : vector<16x32xf32>
    %40 = tpu.matmul %35, %32, %cst_21 {dimension_numbers = #tpu.dot_dimension_numbers<[1], [0], [0], [1], [0, 0, 1, 1], [], []>} : vector<16x8xf32>, vector<8x32xf32>, vector<16x32xf32> -> vector<16x32xf32>
    %41 = vector.extract_strided_slice %12 {offsets = [8, 0], sizes = [8, 32], strides = [1, 1]} : vector<32x32xf32> to vector<8x32xf32>
    %42 = vector.extract_strided_slice %13 {offsets = [8, 0], sizes = [8, 32], strides = [1, 1]} : vector<32x32xf32> to vector<8x32xf32>
    %cst_22 = arith.constant dense<0.000000e+00> : vector<16x8xf32>
    %43 = tpu.matmul %11, %41, %cst_22 {dimension_numbers = #tpu.dot_dimension_numbers<[1], [1], [0], [0], [0, 0, 1, 0], [], []>} : vector<16x32xf32>, vector<8x32xf32>, vector<16x8xf32> -> vector<16x8xf32>
    %cst_23 = arith.constant 0.176776692 : f32
    %44 = vector.broadcast %cst_23 : f32 to vector<16x8xf32>
    %45 = arith.mulf %43, %44 : vector<16x8xf32>
    %cst_24 = arith.constant dense<0.000000e+00> : vector<16x8xf32>
    %46 = tpu.matmul %11, %42, %cst_24 {dimension_numbers = #tpu.dot_dimension_numbers<[1], [1], [0], [0], [0, 0, 1, 0], [], []>} : vector<16x32xf32>, vector<8x32xf32>, vector<16x8xf32> -> vector<16x8xf32>
    %cst_25 = arith.constant 0.176776692 : f32
    %47 = vector.broadcast %cst_25 : f32 to vector<16x8xf32>
    %48 = arith.mulf %46, %47 : vector<16x8xf32>
    %cst_26 = arith.constant dense<0.000000e+00> : vector<16x32xf32>
    %49 = tpu.matmul %48, %41, %cst_26 {dimension_numbers = #tpu.dot_dimension_numbers<[1], [0], [0], [1], [0, 0, 1, 1], [], []>} : vector<16x8xf32>, vector<8x32xf32>, vector<16x32xf32> -> vector<16x32xf32>
    %cst_27 = arith.constant dense<0.000000e+00> : vector<16x32xf32>
    %50 = tpu.matmul %45, %42, %cst_27 {dimension_numbers = #tpu.dot_dimension_numbers<[1], [0], [0], [1], [0, 0, 1, 1], [], []>} : vector<16x8xf32>, vector<8x32xf32>, vector<16x32xf32> -> vector<16x32xf32>
    %51 = vector.extract_strided_slice %12 {offsets = [16, 0], sizes = [8, 32], strides = [1, 1]} : vector<32x32xf32> to vector<8x32xf32>
    %52 = vector.extract_strided_slice %13 {offsets = [16, 0], sizes = [8, 32], strides = [1, 1]} : vector<32x32xf32> to vector<8x32xf32>
    %cst_28 = arith.constant dense<0.000000e+00> : vector<16x8xf32>
    %53 = tpu.matmul %11, %51, %cst_28 {dimension_numbers = #tpu.dot_dimension_numbers<[1], [1], [0], [0], [0, 0, 1, 0], [], []>} : vector<16x32xf32>, vector<8x32xf32>, vector<16x8xf32> -> vector<16x8xf32>
    %cst_29 = arith.constant 0.176776692 : f32
    %54 = vector.broadcast %cst_29 : f32 to vector<16x8xf32>
    %55 = arith.mulf %53, %54 : vector<16x8xf32>
    %cst_30 = arith.constant dense<0.000000e+00> : vector<16x8xf32>
    %56 = tpu.matmul %11, %52, %cst_30 {dimension_numbers = #tpu.dot_dimension_numbers<[1], [1], [0], [0], [0, 0, 1, 0], [], []>} : vector<16x32xf32>, vector<8x32xf32>, vector<16x8xf32> -> vector<16x8xf32>
    %cst_31 = arith.constant 0.176776692 : f32
    %57 = vector.broadcast %cst_31 : f32 to vector<16x8xf32>
    %58 = arith.mulf %56, %57 : vector<16x8xf32>
    %cst_32 = arith.constant dense<0.000000e+00> : vector<16x32xf32>
    %59 = tpu.matmul %58, %51, %cst_32 {dimension_numbers = #tpu.dot_dimension_numbers<[1], [0], [0], [1], [0, 0, 1, 1], [], []>} : vector<16x8xf32>, vector<8x32xf32>, vector<16x32xf32> -> vector<16x32xf32>
    %cst_33 = arith.constant dense<0.000000e+00> : vector<16x32xf32>
    %60 = tpu.matmul %55, %52, %cst_33 {dimension_numbers = #tpu.dot_dimension_numbers<[1], [0], [0], [1], [0, 0, 1, 1], [], []>} : vector<16x8xf32>, vector<8x32xf32>, vector<16x32xf32> -> vector<16x32xf32>
    %61 = vector.extract_strided_slice %12 {offsets = [24, 0], sizes = [8, 32], strides = [1, 1]} : vector<32x32xf32> to vector<8x32xf32>
    %62 = vector.extract_strided_slice %13 {offsets = [24, 0], sizes = [8, 32], strides = [1, 1]} : vector<32x32xf32> to vector<8x32xf32>
    %cst_34 = arith.constant dense<0.000000e+00> : vector<16x8xf32>
    %63 = tpu.matmul %11, %61, %cst_34 {dimension_numbers = #tpu.dot_dimension_numbers<[1], [1], [0], [0], [0, 0, 1, 0], [], []>} : vector<16x32xf32>, vector<8x32xf32>, vector<16x8xf32> -> vector<16x8xf32>
    %cst_35 = arith.constant 0.176776692 : f32
    %64 = vector.broadcast %cst_35 : f32 to vector<16x8xf32>
    %65 = arith.mulf %63, %64 : vector<16x8xf32>
    %cst_36 = arith.constant dense<0.000000e+00> : vector<16x8xf32>
    %66 = tpu.matmul %11, %62, %cst_36 {dimension_numbers = #tpu.dot_dimension_numbers<[1], [1], [0], [0], [0, 0, 1, 0], [], []>} : vector<16x32xf32>, vector<8x32xf32>, vector<16x8xf32> -> vector<16x8xf32>
    %cst_37 = arith.constant 0.176776692 : f32
    %67 = vector.broadcast %cst_37 : f32 to vector<16x8xf32>
    %68 = arith.mulf %66, %67 : vector<16x8xf32>
    %cst_38 = arith.constant dense<0.000000e+00> : vector<16x32xf32>
    %69 = tpu.matmul %68, %61, %cst_38 {dimension_numbers = #tpu.dot_dimension_numbers<[1], [0], [0], [1], [0, 0, 1, 1], [], []>} : vector<16x8xf32>, vector<8x32xf32>, vector<16x32xf32> -> vector<16x32xf32>
    %cst_39 = arith.constant dense<0.000000e+00> : vector<16x32xf32>
    %70 = tpu.matmul %65, %62, %cst_39 {dimension_numbers = #tpu.dot_dimension_numbers<[1], [0], [0], [1], [0, 0, 1, 1], [], []>} : vector<16x8xf32>, vector<8x32xf32>, vector<16x32xf32> -> vector<16x32xf32>
    %c0_40 = arith.constant 0 : index
    %c0_41 = arith.constant 0 : index
    %c0_42 = arith.constant 0 : index
    %c0_43 = arith.constant 0 : index
    %71 = vector.load %arg3[%c0_40, %c0_41, %c0_42, %c0_43] : memref<2x1x8x8xf32, #tpu.memory_space<vmem>>, vector<1x1x8x8xf32>
    %72 = vector.shape_cast %71 : vector<1x1x8x8xf32> to vector<8x8xf32>
    %cst_44 = arith.constant 0.000000e+00 : f32
    %73 = vector.broadcast %cst_44 : f32 to vector<8x32xf32>
    %74 = vector.extract_strided_slice %35 {offsets = [0, 0], sizes = [8, 8], strides = [1, 1]} : vector<16x8xf32> to vector<8x8xf32>
    %75 = vector.extract_strided_slice %38 {offsets = [0, 0], sizes = [8, 8], strides = [1, 1]} : vector<16x8xf32> to vector<8x8xf32>
    %cst_45 = arith.constant dense<0.000000e+00> : vector<8x8xf32>
    %76 = tpu.matmul %74, %75, %cst_45 {dimension_numbers = #tpu.dot_dimension_numbers<[1], [1], [0], [0], [0, 0, 1, 0], [], []>} : vector<8x8xf32>, vector<8x8xf32>, vector<8x8xf32> -> vector<8x8xf32>
    %77 = arith.addf %76, %72 : vector<8x8xf32>
    %cst_46 = arith.constant 2.500000e-01 : f32
    %78 = vector.broadcast %cst_46 : f32 to vector<8x8xf32>
    %79 = arith.mulf %77, %78 : vector<8x8xf32>
    %80 = arith.negf %79 : vector<8x8xf32>
    %81 = math.exp %80 : vector<8x8xf32>
    %cst_47 = arith.constant 1.000000e+00 : f32
    %82 = vector.broadcast %cst_47 : f32 to vector<8x8xf32>
    %83 = arith.addf %82, %81 : vector<8x8xf32>
    %84 = arith.divf %82, %83 : vector<8x8xf32>
    %c0_48 = arith.constant 0 : index
    %c0_49 = arith.constant 0 : index
    %c0_50 = arith.constant 0 : index
    %c0_51 = arith.constant 0 : index
    %85 = vector.load %arg8[%c0_48, %c0_49, %c0_50, %c0_51] : memref<2x4x8x8xf32, #tpu.memory_space<vmem>>, vector<1x1x8x8xf32>
    %86 = vector.shape_cast %85 : vector<1x1x8x8xf32> to vector<8x8xf32>
    %87 = vector.shape_cast %84 : vector<8x8xf32> to vector<1x1x8x8xf32>
    tpu.vector_store %arg8[%c0_48, %c0_49, %c0_50, %c0_51], %87 {strides = array<i32>} : memref<2x4x8x8xf32, #tpu.memory_space<vmem>>, vector<1x1x8x8xf32>,
    %88 = vector.extract_strided_slice %39 {offsets = [0, 0], sizes = [8, 32], strides = [1, 1]} : vector<16x32xf32> to vector<8x32xf32>
    %cst_52 = arith.constant dense<0.000000e+00> : vector<8x32xf32>
    %89 = tpu.matmul %84, %88, %cst_52 {dimension_numbers = #tpu.dot_dimension_numbers<[1], [0], [0], [1], [0, 0, 1, 1], [], []>} : vector<8x8xf32>, vector<8x32xf32>, vector<8x32xf32> -> vector<8x32xf32>
    %90 = arith.addf %73, %89 : vector<8x32xf32>
    %91 = vector.extract_strided_slice %40 {offsets = [0, 0], sizes = [8, 32], strides = [1, 1]} : vector<16x32xf32> to vector<8x32xf32>
    %cst_53 = arith.constant dense<0.000000e+00> : vector<8x32xf32>
    %92 = tpu.matmul %84, %91, %cst_53 {dimension_numbers = #tpu.dot_dimension_numbers<[0], [0], [1], [1], [0, 1, 1, 1], [], []>} : vector<8x8xf32>, vector<8x32xf32>, vector<8x32xf32> -> vector<8x32xf32>
    %93 = arith.addf %90, %92 : vector<8x32xf32>
    %94 = vector.extract_strided_slice %45 {offsets = [0, 0], sizes = [8, 8], strides = [1, 1]} : vector<16x8xf32> to vector<8x8xf32>
    %95 = vector.extract_strided_slice %48 {offsets = [0, 0], sizes = [8, 8], strides = [1, 1]} : vector<16x8xf32> to vector<8x8xf32>
    %cst_54 = arith.constant dense<0.000000e+00> : vector<8x8xf32>
    %96 = tpu.matmul %94, %95, %cst_54 {dimension_numbers = #tpu.dot_dimension_numbers<[1], [1], [0], [0], [0, 0, 1, 0], [], []>} : vector<8x8xf32>, vector<8x8xf32>, vector<8x8xf32> -> vector<8x8xf32>
    %97 = arith.addf %96, %72 : vector<8x8xf32>
    %cst_55 = arith.constant 2.500000e-01 : f32
    %98 = vector.broadcast %cst_55 : f32 to vector<8x8xf32>
    %99 = arith.mulf %97, %98 : vector<8x8xf32>
    %100 = arith.negf %99 : vector<8x8xf32>
    %101 = math.exp %100 : vector<8x8xf32>
    %cst_56 = arith.constant 1.000000e+00 : f32
    %102 = vector.broadcast %cst_56 : f32 to vector<8x8xf32>
    %103 = arith.addf %102, %101 : vector<8x8xf32>
    %104 = arith.divf %102, %103 : vector<8x8xf32>
    %c0_57 = arith.constant 0 : index
    %c1 = arith.constant 1 : index
    %c0_58 = arith.constant 0 : index
    %c0_59 = arith.constant 0 : index
    %105 = vector.load %arg8[%c0_57, %c1, %c0_58, %c0_59] : memref<2x4x8x8xf32, #tpu.memory_space<vmem>>, vector<1x1x8x8xf32>
    %106 = vector.shape_cast %105 : vector<1x1x8x8xf32> to vector<8x8xf32>
    %107 = vector.shape_cast %104 : vector<8x8xf32> to vector<1x1x8x8xf32>
    tpu.vector_store %arg8[%c0_57, %c1, %c0_58, %c0_59], %107 {strides = array<i32>} : memref<2x4x8x8xf32, #tpu.memory_space<vmem>>, vector<1x1x8x8xf32>,
    %108 = vector.extract_strided_slice %49 {offsets = [0, 0], sizes = [8, 32], strides = [1, 1]} : vector<16x32xf32> to vector<8x32xf32>
    %cst_60 = arith.constant dense<0.000000e+00> : vector<8x32xf32>
    %109 = tpu.matmul %104, %108, %cst_60 {dimension_numbers = #tpu.dot_dimension_numbers<[1], [0], [0], [1], [0, 0, 1, 1], [], []>} : vector<8x8xf32>, vector<8x32xf32>, vector<8x32xf32> -> vector<8x32xf32>
    %110 = arith.addf %93, %109 : vector<8x32xf32>
    %111 = vector.extract_strided_slice %50 {offsets = [0, 0], sizes = [8, 32], strides = [1, 1]} : vector<16x32xf32> to vector<8x32xf32>
    %cst_61 = arith.constant dense<0.000000e+00> : vector<8x32xf32>
    %112 = tpu.matmul %104, %111, %cst_61 {dimension_numbers = #tpu.dot_dimension_numbers<[0], [0], [1], [1], [0, 1, 1, 1], [], []>} : vector<8x8xf32>, vector<8x32xf32>, vector<8x32xf32> -> vector<8x32xf32>
    %113 = arith.addf %110, %112 : vector<8x32xf32>
    %114 = vector.extract_strided_slice %55 {offsets = [0, 0], sizes = [8, 8], strides = [1, 1]} : vector<16x8xf32> to vector<8x8xf32>
    %115 = vector.extract_strided_slice %58 {offsets = [0, 0], sizes = [8, 8], strides = [1, 1]} : vector<16x8xf32> to vector<8x8xf32>
    %cst_62 = arith.constant dense<0.000000e+00> : vector<8x8xf32>
    %116 = tpu.matmul %114, %115, %cst_62 {dimension_numbers = #tpu.dot_dimension_numbers<[1], [1], [0], [0], [0, 0, 1, 0], [], []>} : vector<8x8xf32>, vector<8x8xf32>, vector<8x8xf32> -> vector<8x8xf32>
    %117 = arith.addf %116, %72 : vector<8x8xf32>
    %cst_63 = arith.constant 2.500000e-01 : f32
    %118 = vector.broadcast %cst_63 : f32 to vector<8x8xf32>
    %119 = arith.mulf %117, %118 : vector<8x8xf32>
    %120 = arith.negf %119 : vector<8x8xf32>
    %121 = math.exp %120 : vector<8x8xf32>
    %cst_64 = arith.constant 1.000000e+00 : f32
    %122 = vector.broadcast %cst_64 : f32 to vector<8x8xf32>
    %123 = arith.addf %122, %121 : vector<8x8xf32>
    %124 = arith.divf %122, %123 : vector<8x8xf32>
    %c0_65 = arith.constant 0 : index
    %c2 = arith.constant 2 : index
    %c0_66 = arith.constant 0 : index
    %c0_67 = arith.constant 0 : index
    %125 = vector.load %arg8[%c0_65, %c2, %c0_66, %c0_67] : memref<2x4x8x8xf32, #tpu.memory_space<vmem>>, vector<1x1x8x8xf32>
    %126 = vector.shape_cast %125 : vector<1x1x8x8xf32> to vector<8x8xf32>
    %127 = vector.shape_cast %124 : vector<8x8xf32> to vector<1x1x8x8xf32>
    tpu.vector_store %arg8[%c0_65, %c2, %c0_66, %c0_67], %127 {strides = array<i32>} : memref<2x4x8x8xf32, #tpu.memory_space<vmem>>, vector<1x1x8x8xf32>,
    %128 = vector.extract_strided_slice %59 {offsets = [0, 0], sizes = [8, 32], strides = [1, 1]} : vector<16x32xf32> to vector<8x32xf32>
    %cst_68 = arith.constant dense<0.000000e+00> : vector<8x32xf32>
    %129 = tpu.matmul %124, %128, %cst_68 {dimension_numbers = #tpu.dot_dimension_numbers<[1], [0], [0], [1], [0, 0, 1, 1], [], []>} : vector<8x8xf32>, vector<8x32xf32>, vector<8x32xf32> -> vector<8x32xf32>
    %130 = arith.addf %113, %129 : vector<8x32xf32>
    %131 = vector.extract_strided_slice %60 {offsets = [0, 0], sizes = [8, 32], strides = [1, 1]} : vector<16x32xf32> to vector<8x32xf32>
    %cst_69 = arith.constant dense<0.000000e+00> : vector<8x32xf32>
    %132 = tpu.matmul %124, %131, %cst_69 {dimension_numbers = #tpu.dot_dimension_numbers<[0], [0], [1], [1], [0, 1, 1, 1], [], []>} : vector<8x8xf32>, vector<8x32xf32>, vector<8x32xf32> -> vector<8x32xf32>
    %133 = arith.addf %130, %132 : vector<8x32xf32>
    %134 = vector.extract_strided_slice %65 {offsets = [0, 0], sizes = [8, 8], strides = [1, 1]} : vector<16x8xf32> to vector<8x8xf32>
    %135 = vector.extract_strided_slice %68 {offsets = [0, 0], sizes = [8, 8], strides = [1, 1]} : vector<16x8xf32> to vector<8x8xf32>
    %cst_70 = arith.constant dense<0.000000e+00> : vector<8x8xf32>
    %136 = tpu.matmul %134, %135, %cst_70 {dimension_numbers = #tpu.dot_dimension_numbers<[1], [1], [0], [0], [0, 0, 1, 0], [], []>} : vector<8x8xf32>, vector<8x8xf32>, vector<8x8xf32> -> vector<8x8xf32>
    %137 = arith.addf %136, %72 : vector<8x8xf32>
    %cst_71 = arith.constant 2.500000e-01 : f32
    %138 = vector.broadcast %cst_71 : f32 to vector<8x8xf32>
    %139 = arith.mulf %137, %138 : vector<8x8xf32>
    %140 = arith.negf %139 : vector<8x8xf32>
    %141 = math.exp %140 : vector<8x8xf32>
    %cst_72 = arith.constant 1.000000e+00 : f32
    %142 = vector.broadcast %cst_72 : f32 to vector<8x8xf32>
    %143 = arith.addf %142, %141 : vector<8x8xf32>
    %144 = arith.divf %142, %143 : vector<8x8xf32>
    %c0_73 = arith.constant 0 : index
    %c3 = arith.constant 3 : index
    %c0_74 = arith.constant 0 : index
    %c0_75 = arith.constant 0 : index
    %145 = vector.load %arg8[%c0_73, %c3, %c0_74, %c0_75] : memref<2x4x8x8xf32, #tpu.memory_space<vmem>>, vector<1x1x8x8xf32>
    %146 = vector.shape_cast %145 : vector<1x1x8x8xf32> to vector<8x8xf32>
    %147 = vector.shape_cast %144 : vector<8x8xf32> to vector<1x1x8x8xf32>
    tpu.vector_store %arg8[%c0_73, %c3, %c0_74, %c0_75], %147 {strides = array<i32>} : memref<2x4x8x8xf32, #tpu.memory_space<vmem>>, vector<1x1x8x8xf32>,
    %148 = vector.extract_strided_slice %69 {offsets = [0, 0], sizes = [8, 32], strides = [1, 1]} : vector<16x32xf32> to vector<8x32xf32>
    %cst_76 = arith.constant dense<0.000000e+00> : vector<8x32xf32>
    %149 = tpu.matmul %144, %148, %cst_76 {dimension_numbers = #tpu.dot_dimension_numbers<[1], [0], [0], [1], [0, 0, 1, 1], [], []>} : vector<8x8xf32>, vector<8x32xf32>, vector<8x32xf32> -> vector<8x32xf32>
    %150 = arith.addf %133, %149 : vector<8x32xf32>
    %151 = vector.extract_strided_slice %70 {offsets = [0, 0], sizes = [8, 32], strides = [1, 1]} : vector<16x32xf32> to vector<8x32xf32>
    %cst_77 = arith.constant dense<0.000000e+00> : vector<8x32xf32>
    %152 = tpu.matmul %144, %151, %cst_77 {dimension_numbers = #tpu.dot_dimension_numbers<[0], [0], [1], [1], [0, 1, 1, 1], [], []>} : vector<8x8xf32>, vector<8x32xf32>, vector<8x32xf32> -> vector<8x32xf32>
    %153 = arith.addf %150, %152 : vector<8x32xf32>
    %cst_78 = arith.constant 0.176776692 : f32
    %154 = vector.broadcast %cst_78 : f32 to vector<8x32xf32>
    %155 = arith.mulf %153, %154 : vector<8x32xf32>
    %156 = vector.extract_strided_slice %30 {offsets = [0, 0], sizes = [8, 32], strides = [1, 1]} : vector<16x32xf32> to vector<8x32xf32>
    %157 = arith.addf %155, %156 : vector<8x32xf32>
    %158 = vector.extract_strided_slice %1 {offsets = [0, 0], sizes = [8, 32], strides = [1, 1]} : vector<16x32xf32> to vector<8x32xf32>
    %159 = arith.addf %157, %158 : vector<8x32xf32>
    %cst_79 = arith.constant 5.000000e-01 : f32
    %160 = vector.broadcast %cst_79 : f32 to vector<8x32xf32>
    %161 = arith.mulf %159, %160 : vector<8x32xf32>
    %162 = vector.extract_strided_slice %0 {offsets = [0, 0], sizes = [8, 32], strides = [1, 1]} : vector<16x32xf32> to vector<8x32xf32>
    %163 = arith.addf %161, %162 : vector<8x32xf32>
    %cst_80 = arith.constant 5.000000e-01 : f32
    %164 = vector.broadcast %cst_80 : f32 to vector<8x32xf32>
    %165 = arith.mulf %163, %164 : vector<8x32xf32>
    %c0_81 = arith.constant 0 : index
    %c0_82 = arith.constant 0 : index
    %166 = vector.load %arg7[%c0_81, %c0_82] : memref<16x32xf32, #tpu.memory_space<vmem>>, vector<8x32xf32>
    tpu.vector_store %arg7[%c0_81, %c0_82], %165 {strides = array<i32>} : memref<16x32xf32, #tpu.memory_space<vmem>>, vector<8x32xf32>,
    %c1_83 = arith.constant 1 : index
    %c0_84 = arith.constant 0 : index
    %c0_85 = arith.constant 0 : index
    %c0_86 = arith.constant 0 : index
    %167 = vector.load %arg3[%c1_83, %c0_84, %c0_85, %c0_86] : memref<2x1x8x8xf32, #tpu.memory_space<vmem>>, vector<1x1x8x8xf32>
    %168 = vector.shape_cast %167 : vector<1x1x8x8xf32> to vector<8x8xf32>
    %cst_87 = arith.constant 0.000000e+00 : f32
    %169 = vector.broadcast %cst_87 : f32 to vector<8x32xf32>
    %170 = vector.extract_strided_slice %35 {offsets = [8, 0], sizes = [8, 8], strides = [1, 1]} : vector<16x8xf32> to vector<8x8xf32>
    %171 = vector.extract_strided_slice %38 {offsets = [8, 0], sizes = [8, 8], strides = [1, 1]} : vector<16x8xf32> to vector<8x8xf32>
    %cst_88 = arith.constant dense<0.000000e+00> : vector<8x8xf32>
    %172 = tpu.matmul %170, %171, %cst_88 {dimension_numbers = #tpu.dot_dimension_numbers<[1], [1], [0], [0], [0, 0, 1, 0], [], []>} : vector<8x8xf32>, vector<8x8xf32>, vector<8x8xf32> -> vector<8x8xf32>
    %173 = arith.addf %172, %168 : vector<8x8xf32>
    %cst_89 = arith.constant 2.500000e-01 : f32
    %174 = vector.broadcast %cst_89 : f32 to vector<8x8xf32>
    %175 = arith.mulf %173, %174 : vector<8x8xf32>
    %176 = arith.negf %175 : vector<8x8xf32>
    %177 = math.exp %176 : vector<8x8xf32>
    %cst_90 = arith.constant 1.000000e+00 : f32
    %178 = vector.broadcast %cst_90 : f32 to vector<8x8xf32>
    %179 = arith.addf %178, %177 : vector<8x8xf32>
    %180 = arith.divf %178, %179 : vector<8x8xf32>
    %c1_91 = arith.constant 1 : index
    %c0_92 = arith.constant 0 : index
    %c0_93 = arith.constant 0 : index
    %c0_94 = arith.constant 0 : index
    %181 = vector.load %arg8[%c1_91, %c0_92, %c0_93, %c0_94] : memref<2x4x8x8xf32, #tpu.memory_space<vmem>>, vector<1x1x8x8xf32>
    %182 = vector.shape_cast %181 : vector<1x1x8x8xf32> to vector<8x8xf32>
    %183 = vector.shape_cast %180 : vector<8x8xf32> to vector<1x1x8x8xf32>
    tpu.vector_store %arg8[%c1_91, %c0_92, %c0_93, %c0_94], %183 {strides = array<i32>} : memref<2x4x8x8xf32, #tpu.memory_space<vmem>>, vector<1x1x8x8xf32>,
    %184 = vector.extract_strided_slice %39 {offsets = [8, 0], sizes = [8, 32], strides = [1, 1]} : vector<16x32xf32> to vector<8x32xf32>
    %cst_95 = arith.constant dense<0.000000e+00> : vector<8x32xf32>
    %185 = tpu.matmul %180, %184, %cst_95 {dimension_numbers = #tpu.dot_dimension_numbers<[1], [0], [0], [1], [0, 0, 1, 1], [], []>} : vector<8x8xf32>, vector<8x32xf32>, vector<8x32xf32> -> vector<8x32xf32>
    %186 = arith.addf %169, %185 : vector<8x32xf32>
    %187 = vector.extract_strided_slice %40 {offsets = [8, 0], sizes = [8, 32], strides = [1, 1]} : vector<16x32xf32> to vector<8x32xf32>
    %cst_96 = arith.constant dense<0.000000e+00> : vector<8x32xf32>
    %188 = tpu.matmul %180, %187, %cst_96 {dimension_numbers = #tpu.dot_dimension_numbers<[0], [0], [1], [1], [0, 1, 1, 1], [], []>} : vector<8x8xf32>, vector<8x32xf32>, vector<8x32xf32> -> vector<8x32xf32>
    %189 = arith.addf %186, %188 : vector<8x32xf32>
    %190 = vector.extract_strided_slice %45 {offsets = [8, 0], sizes = [8, 8], strides = [1, 1]} : vector<16x8xf32> to vector<8x8xf32>
    %191 = vector.extract_strided_slice %48 {offsets = [8, 0], sizes = [8, 8], strides = [1, 1]} : vector<16x8xf32> to vector<8x8xf32>
    %cst_97 = arith.constant dense<0.000000e+00> : vector<8x8xf32>
    %192 = tpu.matmul %190, %191, %cst_97 {dimension_numbers = #tpu.dot_dimension_numbers<[1], [1], [0], [0], [0, 0, 1, 0], [], []>} : vector<8x8xf32>, vector<8x8xf32>, vector<8x8xf32> -> vector<8x8xf32>
    %193 = arith.addf %192, %168 : vector<8x8xf32>
    %cst_98 = arith.constant 2.500000e-01 : f32
    %194 = vector.broadcast %cst_98 : f32 to vector<8x8xf32>
    %195 = arith.mulf %193, %194 : vector<8x8xf32>
    %196 = arith.negf %195 : vector<8x8xf32>
    %197 = math.exp %196 : vector<8x8xf32>
    %cst_99 = arith.constant 1.000000e+00 : f32
    %198 = vector.broadcast %cst_99 : f32 to vector<8x8xf32>
    %199 = arith.addf %198, %197 : vector<8x8xf32>
    %200 = arith.divf %198, %199 : vector<8x8xf32>
    %c1_100 = arith.constant 1 : index
    %c1_101 = arith.constant 1 : index
    %c0_102 = arith.constant 0 : index
    %c0_103 = arith.constant 0 : index
    %201 = vector.load %arg8[%c1_100, %c1_101, %c0_102, %c0_103] : memref<2x4x8x8xf32, #tpu.memory_space<vmem>>, vector<1x1x8x8xf32>
    %202 = vector.shape_cast %201 : vector<1x1x8x8xf32> to vector<8x8xf32>
    %203 = vector.shape_cast %200 : vector<8x8xf32> to vector<1x1x8x8xf32>
    tpu.vector_store %arg8[%c1_100, %c1_101, %c0_102, %c0_103], %203 {strides = array<i32>} : memref<2x4x8x8xf32, #tpu.memory_space<vmem>>, vector<1x1x8x8xf32>,
    %204 = vector.extract_strided_slice %49 {offsets = [8, 0], sizes = [8, 32], strides = [1, 1]} : vector<16x32xf32> to vector<8x32xf32>
    %cst_104 = arith.constant dense<0.000000e+00> : vector<8x32xf32>
    %205 = tpu.matmul %200, %204, %cst_104 {dimension_numbers = #tpu.dot_dimension_numbers<[1], [0], [0], [1], [0, 0, 1, 1], [], []>} : vector<8x8xf32>, vector<8x32xf32>, vector<8x32xf32> -> vector<8x32xf32>
    %206 = arith.addf %189, %205 : vector<8x32xf32>
    %207 = vector.extract_strided_slice %50 {offsets = [8, 0], sizes = [8, 32], strides = [1, 1]} : vector<16x32xf32> to vector<8x32xf32>
    %cst_105 = arith.constant dense<0.000000e+00> : vector<8x32xf32>
    %208 = tpu.matmul %200, %207, %cst_105 {dimension_numbers = #tpu.dot_dimension_numbers<[0], [0], [1], [1], [0, 1, 1, 1], [], []>} : vector<8x8xf32>, vector<8x32xf32>, vector<8x32xf32> -> vector<8x32xf32>
    %209 = arith.addf %206, %208 : vector<8x32xf32>
    %210 = vector.extract_strided_slice %55 {offsets = [8, 0], sizes = [8, 8], strides = [1, 1]} : vector<16x8xf32> to vector<8x8xf32>
    %211 = vector.extract_strided_slice %58 {offsets = [8, 0], sizes = [8, 8], strides = [1, 1]} : vector<16x8xf32> to vector<8x8xf32>
    %cst_106 = arith.constant dense<0.000000e+00> : vector<8x8xf32>
    %212 = tpu.matmul %210, %211, %cst_106 {dimension_numbers = #tpu.dot_dimension_numbers<[1], [1], [0], [0], [0, 0, 1, 0], [], []>} : vector<8x8xf32>, vector<8x8xf32>, vector<8x8xf32> -> vector<8x8xf32>
    %213 = arith.addf %212, %168 : vector<8x8xf32>
    %cst_107 = arith.constant 2.500000e-01 : f32
    %214 = vector.broadcast %cst_107 : f32 to vector<8x8xf32>
    %215 = arith.mulf %213, %214 : vector<8x8xf32>
    %216 = arith.negf %215 : vector<8x8xf32>
    %217 = math.exp %216 : vector<8x8xf32>
    %cst_108 = arith.constant 1.000000e+00 : f32
    %218 = vector.broadcast %cst_108 : f32 to vector<8x8xf32>
    %219 = arith.addf %218, %217 : vector<8x8xf32>
    %220 = arith.divf %218, %219 : vector<8x8xf32>
    %c1_109 = arith.constant 1 : index
    %c2_110 = arith.constant 2 : index
    %c0_111 = arith.constant 0 : index
    %c0_112 = arith.constant 0 : index
    %221 = vector.load %arg8[%c1_109, %c2_110, %c0_111, %c0_112] : memref<2x4x8x8xf32, #tpu.memory_space<vmem>>, vector<1x1x8x8xf32>
    %222 = vector.shape_cast %221 : vector<1x1x8x8xf32> to vector<8x8xf32>
    %223 = vector.shape_cast %220 : vector<8x8xf32> to vector<1x1x8x8xf32>
    tpu.vector_store %arg8[%c1_109, %c2_110, %c0_111, %c0_112], %223 {strides = array<i32>} : memref<2x4x8x8xf32, #tpu.memory_space<vmem>>, vector<1x1x8x8xf32>,
    %224 = vector.extract_strided_slice %59 {offsets = [8, 0], sizes = [8, 32], strides = [1, 1]} : vector<16x32xf32> to vector<8x32xf32>
    %cst_113 = arith.constant dense<0.000000e+00> : vector<8x32xf32>
    %225 = tpu.matmul %220, %224, %cst_113 {dimension_numbers = #tpu.dot_dimension_numbers<[1], [0], [0], [1], [0, 0, 1, 1], [], []>} : vector<8x8xf32>, vector<8x32xf32>, vector<8x32xf32> -> vector<8x32xf32>
    %226 = arith.addf %209, %225 : vector<8x32xf32>
    %227 = vector.extract_strided_slice %60 {offsets = [8, 0], sizes = [8, 32], strides = [1, 1]} : vector<16x32xf32> to vector<8x32xf32>
    %cst_114 = arith.constant dense<0.000000e+00> : vector<8x32xf32>
    %228 = tpu.matmul %220, %227, %cst_114 {dimension_numbers = #tpu.dot_dimension_numbers<[0], [0], [1], [1], [0, 1, 1, 1], [], []>} : vector<8x8xf32>, vector<8x32xf32>, vector<8x32xf32> -> vector<8x32xf32>
    %229 = arith.addf %226, %228 : vector<8x32xf32>
    %230 = vector.extract_strided_slice %65 {offsets = [8, 0], sizes = [8, 8], strides = [1, 1]} : vector<16x8xf32> to vector<8x8xf32>
    %231 = vector.extract_strided_slice %68 {offsets = [8, 0], sizes = [8, 8], strides = [1, 1]} : vector<16x8xf32> to vector<8x8xf32>
    %cst_115 = arith.constant dense<0.000000e+00> : vector<8x8xf32>
    %232 = tpu.matmul %230, %231, %cst_115 {dimension_numbers = #tpu.dot_dimension_numbers<[1], [1], [0], [0], [0, 0, 1, 0], [], []>} : vector<8x8xf32>, vector<8x8xf32>, vector<8x8xf32> -> vector<8x8xf32>
    %233 = arith.addf %232, %168 : vector<8x8xf32>
    %cst_116 = arith.constant 2.500000e-01 : f32
    %234 = vector.broadcast %cst_116 : f32 to vector<8x8xf32>
    %235 = arith.mulf %233, %234 : vector<8x8xf32>
    %236 = arith.negf %235 : vector<8x8xf32>
    %237 = math.exp %236 : vector<8x8xf32>
    %cst_117 = arith.constant 1.000000e+00 : f32
    %238 = vector.broadcast %cst_117 : f32 to vector<8x8xf32>
    %239 = arith.addf %238, %237 : vector<8x8xf32>
    %240 = arith.divf %238, %239 : vector<8x8xf32>
    %c1_118 = arith.constant 1 : index
    %c3_119 = arith.constant 3 : index
    %c0_120 = arith.constant 0 : index
    %c0_121 = arith.constant 0 : index
    %241 = vector.load %arg8[%c1_118, %c3_119, %c0_120, %c0_121] : memref<2x4x8x8xf32, #tpu.memory_space<vmem>>, vector<1x1x8x8xf32>
    %242 = vector.shape_cast %241 : vector<1x1x8x8xf32> to vector<8x8xf32>
    %243 = vector.shape_cast %240 : vector<8x8xf32> to vector<1x1x8x8xf32>
    tpu.vector_store %arg8[%c1_118, %c3_119, %c0_120, %c0_121], %243 {strides = array<i32>} : memref<2x4x8x8xf32, #tpu.memory_space<vmem>>, vector<1x1x8x8xf32>,
    %244 = vector.extract_strided_slice %69 {offsets = [8, 0], sizes = [8, 32], strides = [1, 1]} : vector<16x32xf32> to vector<8x32xf32>
    %cst_122 = arith.constant dense<0.000000e+00> : vector<8x32xf32>
    %245 = tpu.matmul %240, %244, %cst_122 {dimension_numbers = #tpu.dot_dimension_numbers<[1], [0], [0], [1], [0, 0, 1, 1], [], []>} : vector<8x8xf32>, vector<8x32xf32>, vector<8x32xf32> -> vector<8x32xf32>
    %246 = arith.addf %229, %245 : vector<8x32xf32>
    %247 = vector.extract_strided_slice %70 {offsets = [8, 0], sizes = [8, 32], strides = [1, 1]} : vector<16x32xf32> to vector<8x32xf32>
    %cst_123 = arith.constant dense<0.000000e+00> : vector<8x32xf32>
    %248 = tpu.matmul %240, %247, %cst_123 {dimension_numbers = #tpu.dot_dimension_numbers<[0], [0], [1], [1], [0, 1, 1, 1], [], []>} : vector<8x8xf32>, vector<8x32xf32>, vector<8x32xf32> -> vector<8x32xf32>
    %249 = arith.addf %246, %248 : vector<8x32xf32>
    %cst_124 = arith.constant 0.176776692 : f32
    %250 = vector.broadcast %cst_124 : f32 to vector<8x32xf32>
    %251 = arith.mulf %249, %250 : vector<8x32xf32>
    %252 = vector.extract_strided_slice %30 {offsets = [8, 0], sizes = [8, 32], strides = [1, 1]} : vector<16x32xf32> to vector<8x32xf32>
    %253 = arith.addf %251, %252 : vector<8x32xf32>
    %254 = vector.extract_strided_slice %1 {offsets = [8, 0], sizes = [8, 32], strides = [1, 1]} : vector<16x32xf32> to vector<8x32xf32>
    %255 = arith.addf %253, %254 : vector<8x32xf32>
    %cst_125 = arith.constant 5.000000e-01 : f32
    %256 = vector.broadcast %cst_125 : f32 to vector<8x32xf32>
    %257 = arith.mulf %255, %256 : vector<8x32xf32>
    %258 = vector.extract_strided_slice %0 {offsets = [8, 0], sizes = [8, 32], strides = [1, 1]} : vector<16x32xf32> to vector<8x32xf32>
    %259 = arith.addf %257, %258 : vector<8x32xf32>
    %cst_126 = arith.constant 5.000000e-01 : f32
    %260 = vector.broadcast %cst_126 : f32 to vector<8x32xf32>
    %261 = arith.mulf %259, %260 : vector<8x32xf32>
    %c8 = arith.constant 8 : index
    %c0_127 = arith.constant 0 : index
    %262 = vector.load %arg7[%c8, %c0_127] : memref<16x32xf32, #tpu.memory_space<vmem>>, vector<8x32xf32>
    tpu.vector_store %arg7[%c8, %c0_127], %261 {strides = array<i32>} : memref<16x32xf32, #tpu.memory_space<vmem>>, vector<8x32xf32>,
    return
  }
  func.func @transform_0(%arg0: i32) -> (i32, i32) {
    %c0_i32 = arith.constant 0 : i32
    %c0_i32_0 = arith.constant 0 : i32
    return %arg0, %c0_i32 : i32, i32
  }
  func.func @transform_1(%arg0: i32) -> (i32, i32) {
    %c0_i32 = arith.constant 0 : i32
    %c0_i32_0 = arith.constant 0 : i32
    return %arg0, %c0_i32 : i32, i32
  }
  func.func @transform_2(%arg0: i32) -> (i32, i32, i32, i32) {
    %c0_i32 = arith.constant 0 : i32
    %c0_i32_0 = arith.constant 0 : i32
    %c0_i32_1 = arith.constant 0 : i32
    %c0_i32_2 = arith.constant 0 : i32
    return %arg0, %c0_i32, %c0_i32_0, %c0_i32_1 : i32, i32, i32, i32
  }
  func.func @transform_3(%arg0: i32) -> (i32, i32) {
    %c0_i32 = arith.constant 0 : i32
    %c0_i32_0 = arith.constant 0 : i32
    %c0_i32_1 = arith.constant 0 : i32
    return %c0_i32, %c0_i32_0 : i32, i32
  }
  func.func @transform_4(%arg0: i32) -> (i32, i32) {
    %c0_i32 = arith.constant 0 : i32
    %c0_i32_0 = arith.constant 0 : i32
    %c0_i32_1 = arith.constant 0 : i32
    return %c0_i32, %c0_i32_0 : i32, i32
  }
  func.func @transform_5(%arg0: i32) -> (i32, i32) {
    %c0_i32 = arith.constant 0 : i32
    %c0_i32_0 = arith.constant 0 : i32
    %c0_i32_1 = arith.constant 0 : i32
    return %c0_i32, %c0_i32_0 : i32, i32
  }
  func.func @transform_6(%arg0: i32) -> (i32, i32) {
    %c0_i32 = arith.constant 0 : i32
    %c0_i32_0 = arith.constant 0 : i32
    return %arg0, %c0_i32 : i32, i32
  }
  func.func @transform_7(%arg0: i32) -> (i32, i32, i32, i32) {
    %c0_i32 = arith.constant 0 : i32
    %c0_i32_0 = arith.constant 0 : i32
    %c0_i32_1 = arith.constant 0 : i32
    %c0_i32_2 = arith.constant 0 : i32
    return %arg0, %c0_i32, %c0_i32_0, %c0_i32_1 : i32, i32, i32, i32
  }
}

</mosaic_0001>

<bundles_post_ra>
// kernel: tpu_custom_call.1
= control target key start
LH: loop header
LB: loop body
LE: loop exit
PB: predicated region body
PF: predicated region fallthrough
CT: control target
= control target key end

     0   :  { %13 = vsyncpa [#allocation3], 0  ;;  %s4885_s0 = inlined_call_operand.hbm [shape: f32[16,32], index: 0, kind: input, shape index: {}]   ;;  %s4886_s1 = inlined_call_operand.hbm [shape: f32[16,32], index: 1, kind: input, shape index: {}]   ;;  %s4887_s2 = inlined_call_operand.hbm [shape: f32[2,1,8,8], index: 2, kind: input, shape index: {}]   ;;  %s4888_s3 = inlined_call_operand.hbm [shape: f32[32,32], index: 3, kind: input, shape index: {}]   ;;  %s4889_s4 = inlined_call_operand.hbm [shape: f32[32,32], index: 4, kind: input, shape index: {}]   ;;  %s4890_s5 = inlined_call_operand.vmem [shape: f32[16,32], index: 5, kind: input, shape index: {}]   ;;  %s4891_s6 = inlined_call_operand.hbm [shape: f32[16,32], index: 6, kind: output, shape index: {0}]   ;;  %s4892_s7 = inlined_call_operand.hbm [shape: f32[2,4,8,8], index: 7, kind: output, shape index: {1}]  }
   0x1   :  { %14 = vsyncpa [#allocation6], 0 }
   0x2   :  { %15 = vsyncpa [#allocation9], 0 }
   0x3   :  { %16 = vsyncpa [#allocation4], 0 }
   0x4   :  { %17 = vsyncpa [#allocation13], 0  ;;  %s4400_s24 = smov [#allocation5]   ;;  %s4401_s26 = smov [#allocation8]  }
   0x5   :  { %s35_s25 = sshll.u32 %s4400_s24, 4  ;;  %s59_s27 = sshll.u32 %s4401_s26, 4  ;;  %s36_s25 = int_to_ptr.vmem [resolvable:$true] %s35_s25  ;;  %s4451_s27 = int_to_ptr.vmem [resolvable:$true] %s59_s27 }
   0x6   :  { %s4236_s30 = scalar_lea.hbm %s4886_s1, 256 }
   0x7   :  { %p4237_p0 = scmp.ne.s32.totalorder %s4886_s1, %s4236_s30  ;;  %p4240_p1 = scmp.lt.u32.totalorder %s4236_s30, %s4886_s1 }
   0x9   :  { %p4242_p2 = pnand %p4240_p1, %p4237_p0 }
   0xb   :  { %4245 = shalt.err (!%p4242_p2)
}
   0xc   :  { %s4246_s12 = scalar_lea.vmem %s36_s25, 256  ;;  %p4251_p4 = scmp.lt.s32.totalorder %s36_s25, %s36_s25 }
   0xd   :  { %p4247_p3 = scmp.ne.s32.totalorder %s36_s25, %s4246_s12  ;;  %p4252_p5 = scmp.lt.s32.totalorder %s4246_s12, %s4246_s12 }
   0xf   :  { %p4253_p6 = por %p4252_p5, %p4251_p4 }
  0x11   :  { %p4254_p7 = pnand %p4253_p6, %p4247_p3 }
  0x13   :  { %4257 = shalt.err (!%p4254_p7)
}
  0x14   :  { %s4402_s13 = smov 128   ;;  %s4403_s14 = smov 8  }
  0x15   :  { %41 = dma.hbm_to_vmem [thread:$0]  %s4886_s1, 256, %s36_s25, [#allocation6], %s4402_s13, %s4402_s13, %s4403_s14  }
  0x16   :  { %s4258_s19 = scalar_lea.hbm %s4888_s3, 512 }
  0x17   :  { %p4259_p8 = scmp.ne.s32.totalorder %s4888_s3, %s4258_s19  ;;  %p4262_p9 = scmp.lt.u32.totalorder %s4258_s19, %s4888_s3 }
  0x19   :  { %p4264_p10 = pnand %p4262_p9, %p4259_p8 }
  0x1b   :  { %4267 = shalt.err (!%p4264_p10)
}
  0x1c   :  { %s4268_s24 = scalar_lea.vmem %s4451_s27, 512  ;;  %p4273_p12 = scmp.lt.s32.totalorder %s4451_s27, %s4451_s27 }
  0x1d   :  { %p4269_p11 = scmp.ne.s32.totalorder %s4451_s27, %s4268_s24  ;;  %p4274_p13 = scmp.lt.s32.totalorder %s4268_s24, %s4268_s24 }
  0x1f   :  { %p4275_p0 = por %p4274_p13, %p4273_p12 }
  0x21   :  { %p4276_p1 = pnand %p4275_p0, %p4269_p11 }
  0x23   :  { %4279 = shalt.err (!%p4276_p1)
}
  0x24   :  { %65 = dma.hbm_to_vmem [thread:$0]  %s4888_s3, 512, %s4451_s27, [#allocation9], %s4402_s13, %s4402_s13, %s4403_s14  }
  0x25   :  { %s4404_s26 = smov [#allocation2]   ;;  %s4405_s29 = smov [#allocation7]  }
  0x26   :  { %s23_s28 = sshll.u32 %s4404_s26, 4  ;;  %s47_s30 = sshll.u32 %s4405_s29, 4  ;;  %s24_s28 = int_to_ptr.vmem [resolvable:$true] %s23_s28  ;;  %s4488_s30 = int_to_ptr.vmem [resolvable:$true] %s47_s30 }
  0x27   :  { %s4280_s10 = scalar_lea.hbm %s4885_s0, 256 }
  0x28   :  { %p4281_p2 = scmp.ne.s32.totalorder %s4885_s0, %s4280_s10  ;;  %p4284_p3 = scmp.lt.u32.totalorder %s4280_s10, %s4885_s0 }
  0x2a   :  { %p4286_p4 = pnand %p4284_p3, %p4281_p2 }
  0x2c   :  { %4289 = shalt.err (!%p4286_p4)
}
  0x2d   :  { %s4290_s3 = scalar_lea.vmem %s24_s28, 256  ;;  %p4295_p6 = scmp.lt.s32.totalorder %s24_s28, %s24_s28 }
  0x2e   :  { %p4291_p5 = scmp.ne.s32.totalorder %s24_s28, %s4290_s3  ;;  %p4296_p7 = scmp.lt.s32.totalorder %s4290_s3, %s4290_s3 }
  0x30   :  { %p4297_p8 = por %p4296_p7, %p4295_p6 }
  0x32   :  { %p4298_p9 = pnand %p4297_p8, %p4291_p5 }
  0x34   :  { %4301 = shalt.err (!%p4298_p9)
}
  0x35   :  { %29 = dma.hbm_to_vmem [thread:$0]  %s4885_s0, 256, %s24_s28, [#allocation3], %s4402_s13, %s4402_s13, %s4403_s14  }
  0x36   :  { %s4302_s20 = scalar_lea.hbm %s4887_s2, 256 }
  0x37   :  { %p4303_p10 = scmp.ne.s32.totalorder %s4887_s2, %s4302_s20  ;;  %p4306_p11 = scmp.lt.u32.totalorder %s4302_s20, %s4887_s2 }
  0x39   :  { %p4308_p12 = pnand %p4306_p11, %p4303_p10 }
  0x3b   :  { %4311 = shalt.err (!%p4308_p12)
}
  0x3c   :  { %s4312_s1 = scalar_lea.vmem %s4488_s30, 256  ;;  %p4317_p0 = scmp.lt.s32.totalorder %s4488_s30, %s4488_s30 }
  0x3d   :  { %p4313_p13 = scmp.ne.s32.totalorder %s4488_s30, %s4312_s1  ;;  %p4318_p1 = scmp.lt.s32.totalorder %s4312_s1, %s4312_s1 }
  0x3f   :  { %p4319_p2 = por %p4318_p1, %p4317_p0 }
  0x41   :  { %p4320_p3 = pnand %p4319_p2, %p4313_p13 }
  0x43   :  { %4323 = shalt.err (!%p4320_p3)
}
  0x44   :  { %53 = dma.hbm_to_vmem [thread:$0]  %s4887_s2, 256, %s4488_s30, [#allocation6], %s4402_s13, %s4402_s13, %s4403_s14  }
  0x45   :  { %s4406_s26 = smov [#allocation10]   ;;  %s4324_s9 = scalar_lea.hbm %s4889_s4, 512 }
  0x46   :  { %s71_s28 = sshll.u32 %s4406_s26, 4  ;;  %p4325_p4 = scmp.ne.s32.totalorder %s4889_s4, %s4324_s9  ;;  %s72_s28 = int_to_ptr.vmem [resolvable:$true] %s71_s28 }
  0x47   :  { %p4328_p5 = scmp.lt.u32.totalorder %s4324_s9, %s4889_s4 }
  0x49   :  { %p4330_p6 = pnand %p4328_p5, %p4325_p4 }
  0x4b   :  { %4333 = shalt.err (!%p4330_p6)
}
  0x4c   :  { %s4334_s16 = scalar_lea.vmem %s72_s28, 512  ;;  %p4339_p8 = scmp.lt.s32.totalorder %s72_s28, %s72_s28 }
  0x4d   :  { %p4335_p7 = scmp.ne.s32.totalorder %s72_s28, %s4334_s16  ;;  %p4340_p9 = scmp.lt.s32.totalorder %s4334_s16, %s4334_s16 }
  0x4f   :  { %p4341_p10 = por %p4340_p9, %p4339_p8 }
  0x51   :  { %p4342_p11 = pnand %p4341_p10, %p4335_p7 }
  0x53   :  { %4345 = shalt.err (!%p4342_p11)
}
  0x54   :  { %77 = dma.hbm_to_vmem [thread:$0]  %s4889_s4, 512, %s72_s28, [#allocation9], %s4402_s13, %s4402_s13, %s4403_s14  }
  0x55   :  { %4390 = dma.done.wait [#allocation3], 256  }
  0x56   :  { %4391 = vsyncadd [#allocation3], 4294967040 }
  0x57   :  { %4392 = dma.done.wait [#allocation6], 512  }
  0x58   :  { %4393 = vsyncadd [#allocation6], 4294966784 }
  0x59   :  { %4394 = dma.done.wait [#allocation9], 1024  }
  0x5a   :  { %4395 = vsyncadd [#allocation9], 4294966272  ;;  %vm99_vm0 = vcmask 261120   ;;  %v4540_v0 = vld [vmem:[#allocation5] sm:$0xff]  ;;  %v4542_v1 = vld [vmem:[#allocation5 + $0x8] sm:$0xff]  ;;  %vm221_vm2 = vcmask 130048  }
  0x5b   :  { %v100_v2 = vsel %vm99_vm0, %v4540_v0, -inf  ;;  %v103_v3 = vsel %vm99_vm0, %v4542_v1, -inf  ;;  %v130_v14 = vld [vmem:[%s4890_s5] sm:$0xff]  ;;  %v131_v15 = vld [vmem:[%s4890_s5 + $0x8] sm:$0xff]  ;;  %vm4140_vm1 = vmpackc.low %vm99_vm0, %vm99_vm0  ;;  %vm487_vm3 = vcmask 64512   ;;  %vm4408_vm4 = vmmov 0  }
  0x5c   :  { %101 = vmax.xlane.f32.xlu0 %v100_v2  ;;  %v4139_v16 = vpack.c.bf16 %v131_v15, %v130_v14  ;;  %v122_v17 = vld [vmem:[#allocation8] sm:$0xff]  ;;  %v127_v50 = vld [vmem:[#allocation10 + $0x8] sm:$0xff]  ;;  %v124_v61 = vld [vmem:[#allocation8 + $0x10] sm:$0xff]  ;;  %s4409_s5 = smov [#allocation12]  }
  0x5d   :  { %3939 = vmatprep.subr.msk.mxu1 %vm99_vm0, %v122_v17  ;;  %v126_v42 = vld [vmem:[#allocation10] sm:$0xff]  ;;  %v123_v52 = vld [vmem:[#allocation8 + $0x8] sm:$0xff]  ;;  %s3717_s18 = sshll.u32 %s4409_s5, 4  ;;  %s3718_s18 = int_to_ptr.vmem [resolvable:$true] %s3717_s18 }
  0x5e   :  { %4141 = vmatprep.subr.msk.bf16.mxu0 %vm4140_vm1, %v4139_v16  ;;  %3940 = vmatpush3.xpose.msk.msra.mxu1 %vm99_vm0, %v122_v17  ;;  %s4346_s19 = scalar_lea.vmem %s3718_s18, 1024  ;;  %p4351_p13 = scmp.lt.s32.totalorder %s3718_s18, %s3718_s18 }
  0x5f   :  { %4144 = vmatpush3.bf16.xpose.msk.msra.mxu0 %vm4140_vm1, %v4139_v16  ;;  %3949 = vmatprep.subr.mxu1 %v122_v17  ;;  %p4347_p12 = scmp.ne.s32.totalorder %s3718_s18, %s4346_s19  ;;  %p4352_p0 = scmp.lt.s32.totalorder %s4346_s19, %s4346_s19 }
  0x60   :  { %104 = vmax.xlane.f32.xlu0 %v103_v3  ;;  %4146 = vmatprep.subr.bf16.mxu0 %v4139_v16 }
  0x61   :  { %p4353_p1 = por %p4352_p0, %p4351_p13 }
  0x63   :  { %p4354_p2 = pnand %p4353_p1, %p4347_p12 }
  0xe9   :  { %v102_v4 = vpop.xlane.xlu0 %101 }
  0xea   :  { %v106_v5 = vsub.f32 %v4540_v0, %v102_v4  ;;  %v128_v4 = vld [vmem:[#allocation10 + $0x10] sm:$0xff] }
  0xec   :  { %v108_v6 = vmul.f32 1.442695, %v106_v5 }
  0xed   :  { %v105_v7 = vpop.xlane.xlu0 %104 }
  0xee   :  { %4188 = vpow2.f32 %v108_v6  ;;  %v107_v8 = vsub.f32 %v4542_v1, %v105_v7 }
  0xf0   :  { %v110_v9 = vmul.f32 1.442695, %v107_v8 }
  0xf2   :  { %4190 = vpow2.f32 %v110_v9 }
  0xf8   :  { %v4189_v10 = vpop.eup %4188 }
  0xf9   :  { %v112_v11 = vsel %vm99_vm0, %v4189_v10, 0.0 }
  0xfa   :  { %113 = vadd.xlane.f32.xlu1 %v112_v11 }
  0xfc   :  { %v4191_v12 = vpop.eup %4190 }
  0xfd   :  { %v115_v13 = vsel %vm99_vm0, %v4191_v12, 0.0 }
  0xfe   :  { %116 = vadd.xlane.f32.xlu1 %v115_v13  ;;  %v129_v13 = vld [vmem:[#allocation10 + $0x18] sm:$0xff] }
 0x187   :  { %v114_v18 = vpop.xlane.xlu1 %113 }
 0x188   :  { %4192 = vrcp.f32 %v114_v18  ;;  %v125_v18 = vld [vmem:[#allocation8 + $0x18] sm:$0xff] }
 0x18b   :  { %v117_v19 = vpop.xlane.xlu1 %116 }
 0x18c   :  { %4194 = vrcp.f32 %v117_v19  ;;  %v4407_v19 = vmov 0.0  }
 0x192   :  { %v4193_v20 = vpop.eup %4192 }
 0x193   :  { %v4562_v21 = vmul.f32 %v4193_v20, %v4189_v10 }
 0x195   :  { %3929 = vmatprep.mubr.msk.f32.mxu0 %vm99_vm0, %v4562_v21  ;;  %3941 = vmatprep.mubr.msk.f32.mxu1 %vm99_vm0, %v4562_v21 }
 0x196   :  { %v4195_v22 = vpop.eup %4194 }
 0x197   :  { %v4568_v23 = vmul.f32 %v4195_v22, %v4191_v12 }
 0x199   :  { %3930 = vmatmul.mubr.msk.f32.vlgmr.msra.gmra.mrb[0].mxu0 %vm99_vm0, %v4568_v23  ;;  %3942 = vmatmul.mubr.msk.f32.vlgmr.msra.gmra.mrb[0].mxu1 %vm99_vm0, %v4568_v23 }
 0x19a   :  { %4148 = vmatpush3.bf16.msra.mxu0 %v4139_v16  ;;  %3950 = vmatpush3.msra.mxu1 %v122_v17 }
 0x19b   :  { %3944 = vmatprep.subr.msk.mxu0 %vm99_vm0, %v126_v42  ;;  %3959 = vmatprep.subr.msk.mxu1 %vm99_vm0, %v123_v52 }
 0x26c   :  { %v3931_v24 = vpop.f32.mrb[0].mxu0  ;;  %v3943_v25 = vpop.f32.mrb[0].mxu1 }
 0x26d   :  { %v220_v26 = vmul.f32 0.088388346, %v3931_v24  ;;  %v210_v27 = vpop.f32.mrb[1].mxu0  ;;  %v396_v28 = vpop.f32.mrb[1].mxu1  ;;  %v4590_v51 = vmul.f32 0.17677669, %v3943_v25 }
 0x26e   :  { %v219_v29 = vmul.f32 0.088388346, %v210_v27  ;;  %v4584_v49 = vmul.f32 0.17677669, %v396_v28 }
 0x26f   :  { %v225_v30 = vsel %vm221_vm2, %v220_v26, -inf }
 0x270   :  { %226 = vmax.xlane.f32.xlu1 %v225_v30  ;;  %v222_v31 = vsel %vm221_vm2, %v219_v29, -inf }
 0x271   :  { %223 = vmax.xlane.f32.xlu0 %v222_v31 }
 0x2fd   :  { %v227_v32 = vpop.xlane.xlu1 %226 }
 0x2fe   :  { %v229_v33 = vsub.f32 %v220_v26, %v227_v32  ;;  %v224_v34 = vpop.xlane.xlu0 %223 }
 0x2ff   :  { %v228_v35 = vsub.f32 %v219_v29, %v224_v34 }
 0x300   :  { %v232_v36 = vmul.f32 1.442695, %v229_v33 }
 0x301   :  { %v230_v37 = vmul.f32 1.442695, %v228_v35 }
 0x302   :  { %4196 = vpow2.f32 %v232_v36 }
 0x303   :  { %4198 = vpow2.f32 %v230_v37 }
 0x30c   :  { %v4197_v38 = vpop.eup %4196 }
 0x30d   :  { %v4199_v39 = vpop.eup %4198  ;;  %v237_v40 = vsel %vm221_vm2, %v4197_v38, 0.0 }
 0x30e   :  { %238 = vadd.xlane.f32.xlu1 %v237_v40  ;;  %v234_v41 = vsel %vm221_vm2, %v4199_v39, 0.0  ;;  %v1616_v40 = vld [vmem:[#allocation7] sm:$0xff] }
 0x30f   :  { %235 = vadd.xlane.f32.xlu0 %v234_v41 }
 0x39b   :  { %v239_v43 = vpop.xlane.xlu1 %238 }
 0x39c   :  { %4200 = vrcp.f32 %v239_v43  ;;  %v236_v44 = vpop.xlane.xlu0 %235 }
 0x39d   :  { %4202 = vrcp.f32 %v236_v44 }
 0x3a6   :  { %v4201_v45 = vpop.eup %4200 }
 0x3a7   :  { %v4203_v46 = vpop.eup %4202  ;;  %v243_v48 = vmul.f32 %v4201_v45, %v4197_v38 }
 0x3a8   :  { %v242_v47 = vmul.f32 %v4203_v46, %v4199_v39 }
 0x3aa   :  { %3936 = vmatprep.mubr.msk.f32.mxu0 %vm221_vm2, %v242_v47 }
 0x3ab   :  { %3937 = vmatmul.mubr.msk.f32.vlgmr.msra.gmra.mrb[2].mxu0 %vm221_vm2, %v243_v48 }
 0x3ac   :  { %3945 = vmatpush3.xpose.msk.msra.mxu0 %vm99_vm0, %v126_v42  ;;  %3946 = vmatprep.mubr.msk.f32.mxu0 %vm99_vm0, %v4562_v21 }
 0x3ad   :  { %3954 = vmatprep.subr.mxu0 %v126_v42 }
 0x3af   :  { %3947 = vmatmul.mubr.msk.f32.vlgmr.msra.gmra.mrb[4].mxu0 %vm99_vm0, %v4568_v23 }
 0x3b0   :  { %3955 = vmatpush3.msra.mxu0 %v126_v42  ;;  %3956 = vmatprep.mubr.msk.f32.mxu0 %vm487_vm3, %v4584_v49 }
 0x3b1   :  { %3964 = vmatprep.subr.msk.mxu0 %vm99_vm0, %v127_v50 }
 0x3b3   :  { %3957 = vmatmul.mubr.msk.f32.vlgmr.msra.gmra.mrb[6].mxu0 %vm487_vm3, %v4590_v51 }
 0x3b4   :  { %3966 = vmatprep.mubr.msk.f32.mxu0 %vm99_vm0, %v4562_v21 }
 0x3b7   :  { %3965 = vmatpush3.xpose.msk.msra.mxu0 %vm99_vm0, %v127_v50 }
 0x3b8   :  { %3974 = vmatprep.subr.mxu0 %v127_v50 }
 0x3ba   :  { %3967 = vmatmul.mubr.msk.f32.vlgmr.msra.gmra.mrb[8].mxu0 %vm99_vm0, %v4568_v23 }
 0x3bb   :  { %3975 = vmatpush3.msra.mxu0 %v127_v50 }
 0x3bc   :  { %3984 = vmatprep.subr.msk.mxu0 %vm99_vm0, %v128_v4 }
 0x47e   :  { %v4601_v53 = vpop.f32.mrb[2].mxu0 }
 0x47f   :  { %v4603_v54 = vpop.f32.mrb[3].mxu0 }
 0x482   :  { %v3948_v55 = vpop.f32.mrb[4].mxu0 }
 0x483   :  { %v476_v56 = vpop.f32.mrb[5].mxu0  ;;  %v4607_v58 = vmul.f32 0.17677669, %v3948_v55 }
 0x484   :  { %v4605_v57 = vmul.f32 0.17677669, %v476_v56 }
 0x486   :  { %3951 = vmatprep.mubr.msk.f32.mxu1 %vm487_vm3, %v4605_v57  ;;  %v4611_v59 = vpop.f32.mrb[6].mxu0 }
 0x487   :  { %3952 = vmatmul.mubr.msk.f32.vlgmr.msra.gmra.mrb[2].mxu1 %vm487_vm3, %v4607_v58  ;;  %v4615_v60 = vpop.f32.mrb[7].mxu0 }
 0x488   :  { %3960 = vmatpush3.xpose.msk.msra.mxu1 %vm99_vm0, %v123_v52  ;;  %3961 = vmatprep.mubr.msk.f32.mxu1 %vm99_vm0, %v4562_v21 }
 0x489   :  { %3969 = vmatprep.subr.mxu1 %v123_v52 }
 0x48b   :  { %3962 = vmatmul.mubr.msk.f32.vlgmr.msra.gmra.mrb[4].mxu1 %vm99_vm0, %v4568_v23 }
 0x48c   :  { %3970 = vmatpush3.msra.mxu1 %v123_v52 }
 0x48d   :  { %v3968_v62 = vpop.f32.mrb[8].mxu0  ;;  %3979 = vmatprep.subr.msk.mxu1 %vm99_vm0, %v124_v61 }
 0x48e   :  { %v799_v63 = vpop.f32.mrb[9].mxu0  ;;  %v4625_v3 = vmul.f32 0.17677669, %v3968_v62 }
 0x48f   :  { %v4623_v2 = vmul.f32 0.17677669, %v799_v63 }
 0x491   :  { %3971 = vmatprep.mubr.msk.f32.mxu1 %vm487_vm3, %v4623_v2 }
 0x492   :  { %3972 = vmatmul.mubr.msk.f32.vlgmr.msra.gmra.mrb[6].mxu1 %vm487_vm3, %v4625_v3 }
 0x493   :  { %3980 = vmatpush3.xpose.msk.msra.mxu1 %vm99_vm0, %v124_v61  ;;  %3981 = vmatprep.mubr.msk.f32.mxu1 %vm99_vm0, %v4562_v21 }
 0x494   :  { %3989 = vmatprep.subr.mxu1 %v124_v61 }
 0x496   :  { %3982 = vmatmul.mubr.msk.f32.vlgmr.msra.gmra.mrb[8].mxu1 %vm99_vm0, %v4568_v23 }
 0x497   :  { %3990 = vmatpush3.msra.mxu1 %v124_v61 }
 0x498   :  { %3999 = vmatprep.subr.msk.mxu1 %vm99_vm0, %v125_v18 }
 0x55a   :  { %v4637_v5 = vpop.f32.mrb[2].mxu1 }
 0x55b   :  { %v4639_v6 = vpop.f32.mrb[3].mxu1 }
 0x55e   :  { %v3963_v7 = vpop.f32.mrb[4].mxu1 }
 0x55f   :  { %v719_v8 = vpop.f32.mrb[5].mxu1  ;;  %v4641_v10 = vmul.f32 0.17677669, %v3963_v7 }
 0x560   :  { %v728_v9 = vmul.f32 0.17677669, %v719_v8 }
 0x562   :  { %3976 = vmatprep.mubr.msk.f32.mxu0 %vm487_vm3, %v728_v9 }
 0x563   :  { %3977 = vmatmul.mubr.msk.f32.vlgmr.msra.gmra.mrb[10].mxu0 %vm487_vm3, %v4641_v10 }
 0x564   :  { %3985 = vmatpush3.xpose.msk.msra.mxu0 %vm99_vm0, %v128_v4  ;;  %3986 = vmatprep.mubr.msk.f32.mxu0 %vm99_vm0, %v4562_v21 }
 0x565   :  { %v4649_v11 = vpop.f32.mrb[6].mxu1  ;;  %3994 = vmatprep.subr.mxu0 %v128_v4 }
 0x566   :  { %v4651_v12 = vpop.f32.mrb[7].mxu1 }
 0x567   :  { %3987 = vmatmul.mubr.msk.f32.vlgmr.msra.gmra.mrb[12].mxu0 %vm99_vm0, %v4568_v23 }
 0x568   :  { %3995 = vmatpush3.msra.mxu0 %v128_v4 }
 0x569   :  { %v3983_v14 = vpop.f32.mrb[8].mxu1  ;;  %4004 = vmatprep.subr.msk.mxu0 %vm99_vm0, %v129_v13 }
 0x56a   :  { %v1041_v15 = vpop.f32.mrb[9].mxu1  ;;  %v4656_v17 = vmul.f32 0.17677669, %v3983_v14 }
 0x56b   :  { %v1050_v16 = vmul.f32 0.17677669, %v1041_v15 }
 0x56d   :  { %3996 = vmatprep.mubr.msk.f32.mxu0 %vm487_vm3, %v1050_v16 }
 0x56e   :  { %3997 = vmatmul.mubr.msk.f32.vlgmr.msra.gmra.mrb[14].mxu0 %vm487_vm3, %v4656_v17 }
 0x56f   :  { %4005 = vmatpush3.xpose.msk.msra.mxu0 %vm99_vm0, %v129_v13  ;;  %4006 = vmatprep.mubr.msk.f32.mxu0 %vm99_vm0, %v4562_v21 }
 0x570   :  { %4014 = vmatprep.subr.mxu0 %v129_v13 }
 0x572   :  { %4007 = vmatmul.mubr.msk.f32.vlgmr.msra.gmra.mrb[16].mxu0 %vm99_vm0, %v4568_v23 }
 0x573   :  { %4015 = vmatpush3.msra.mxu0 %v129_v13 }
 0x574   :  { %4024 = vmatprep.subr.mxu0 %v4407_v19 }
 0x636   :  { %v4668_v20 = vpop.f32.mrb[10].mxu0 }
 0x637   :  { %v4670_v22 = vpop.f32.mrb[11].mxu0 }
 0x63a   :  { %v3988_v24 = vpop.f32.mrb[12].mxu0 }
 0x63b   :  { %v1121_v25 = vpop.f32.mrb[13].mxu0  ;;  %v4672_v27 = vmul.f32 0.17677669, %v3988_v24 }
 0x63c   :  { %v1130_v26 = vmul.f32 0.17677669, %v1121_v25 }
 0x63e   :  { %3991 = vmatprep.mubr.msk.f32.mxu1 %vm487_vm3, %v1130_v26 }
 0x63f   :  { %3992 = vmatmul.mubr.msk.f32.vlgmr.msra.gmra.mrb[10].mxu1 %vm487_vm3, %v4672_v27 }
 0x640   :  { %4000 = vmatpush3.xpose.msk.msra.mxu1 %vm99_vm0, %v125_v18  ;;  %4001 = vmatprep.mubr.msk.f32.mxu1 %vm99_vm0, %v4562_v21 }
 0x641   :  { %v4680_v28 = vpop.f32.mrb[14].mxu0  ;;  %4009 = vmatprep.subr.mxu1 %v125_v18 }
 0x642   :  { %v4682_v29 = vpop.f32.mrb[15].mxu0 }
 0x643   :  { %4002 = vmatmul.mubr.msk.f32.vlgmr.msra.gmra.mrb[12].mxu1 %vm99_vm0, %v4568_v23 }
 0x644   :  { %4010 = vmatpush3.msra.mxu1 %v125_v18 }
 0x645   :  { %v4008_v30 = vpop.f32.mrb[16].mxu0  ;;  %4019 = vmatprep.subr.mxu1 %v4407_v19 }
 0x646   :  { %v1443_v31 = vpop.f32.mrb[17].mxu0  ;;  %v4687_v33 = vmul.f32 0.17677669, %v4008_v30 }
 0x647   :  { %v1452_v32 = vmul.f32 0.17677669, %v1443_v31 }
 0x649   :  { %4011 = vmatprep.mubr.msk.f32.mxu1 %vm487_vm3, %v1452_v32 }
 0x64a   :  { %4012 = vmatmul.mubr.msk.f32.vlgmr.msra.gmra.mrb[14].mxu1 %vm487_vm3, %v4687_v33 }
 0x64b   :  { %4020 = vmatpush3.xpose.msk.msra.mxu1 %vm487_vm3, %v4605_v57  ;;  %4021 = vmatprep.mubr.msk.f32.mxu1 %vm4408_vm4, %v4407_v19 }
 0x64c   :  { %4034 = vmatprep.subr.mxu1 %v4407_v19 }
 0x64e   :  { %4022 = vmatmul.mubr.msk.f32.vlgmr.msra.gmra.mrb[16].mxu1 %vm487_vm3, %v4584_v49 }
 0x64f   :  { %4035 = vmatpush3.xpose.msk.msra.mxu1 %vm487_vm3, %v4623_v2  ;;  %4036 = vmatprep.mubr.msk.f32.mxu1 %vm4408_vm4, %v4407_v19 }
 0x650   :  { %4049 = vmatprep.subr.mxu1 %v4407_v19 }
 0x652   :  { %4037 = vmatmul.mubr.msk.f32.vlgmr.msra.gmra.mrb[18].mxu1 %vm487_vm3, %v728_v9 }
 0x653   :  { %4050 = vmatpush3.xpose.msk.msra.mxu1 %vm487_vm3, %v1130_v26  ;;  %4051 = vmatprep.mubr.msk.f32.mxu1 %vm4408_vm4, %v4407_v19 }
 0x654   :  { %4064 = vmatprep.subr.mxu1 %v4407_v19 }
 0x656   :  { %4052 = vmatmul.mubr.msk.f32.vlgmr.msra.gmra.mrb[20].mxu1 %vm487_vm3, %v1050_v16  ;;  %v4773_v16 = vld [vmem:[#allocation7 + $0x8] sm:$0xff] }
 0x657   :  { %4065 = vmatpush3.xpose.msk.msra.mxu1 %vm487_vm3, %v1452_v32  ;;  %4066 = vmatprep.mubr.msk.f32.mxu1 %vm4408_vm4, %v4407_v19 }
 0x658   :  { %4079 = vmatprep.subr.mxu1 %v4407_v19 }
 0x712   :  { %v4714_v21 = vpop.f32.mrb[10].mxu1 }
 0x713   :  { %v4716_v23 = vpop.f32.mrb[11].mxu1 }
 0x716   :  { %v4003_v34 = vpop.f32.mrb[12].mxu1 }
 0x717   :  { %v1363_v35 = vpop.f32.mrb[13].mxu1  ;;  %v4718_v37 = vmul.f32 0.17677669, %v4003_v34 }
 0x718   :  { %v1372_v36 = vmul.f32 0.17677669, %v1363_v35 }
 0x71a   :  { %4016 = vmatprep.mubr.msk.f32.mxu0 %vm487_vm3, %v1372_v36  ;;  %4067 = vmatmul.mubr.msk.f32.vlgmr.msra.gmra.mrb[22].mxu1 %vm487_vm3, %v1372_v36 }
 0x71b   :  { %4080 = vmatpush3.xpose.msk.msra.mxu1 %vm487_vm3, %v4607_v58  ;;  %4017 = vmatmul.mubr.msk.f32.vlgmr.msra.gmra.mrb[18].mxu0 %vm487_vm3, %v4718_v37 }
 0x71c   :  { %4025 = vmatpush3.msra.mxu0 %v4615_v60  ;;  %4081 = vmatprep.mubr.msk.f32.mxu1 %vm4408_vm4, %v4407_v19 }
 0x71d   :  { %v4729_v38 = vpop.f32.mrb[14].mxu1  ;;  %4084 = vmatprep.subr.mxu1 %v4407_v19  ;;  %4026 = vmatprep.mubr.msk.f32.mxu0 %vm4408_vm4, %v4407_v19 }
 0x71e   :  { %v4734_v39 = vpop.f32.mrb[15].mxu1  ;;  %4082 = vmatmul.mubr.msk.f32.vlgmr.msra.gmra.mrb[24].mxu1 %vm487_vm3, %v4590_v51  ;;  %4029 = vmatprep.subr.mxu0 %v4407_v19 }
 0x71f   :  { %4085 = vmatpush3.msra.mxu1 %v4611_v59  ;;  %4086 = vmatprep.mubr.msk.f32.mxu1 %vm4408_vm4, %v4407_v19 }
 0x720   :  { %4089 = vmatprep.subr.mxu1 %v4407_v19 }
 0x721   :  { %v1683_v41 = vpop.f32.mrb[16].mxu1 }
 0x722   :  { %v1684_v42 = vadd.f32 %v1683_v41, %v1616_v40  ;;  %v4023_v43 = vpop.f32.mrb[17].mxu1 }
 0x723   :  { %v325_v43 = vmul.f32 0.17677669, %v4603_v54 }
 0x724   :  { %v3783_v44 = vmul.f32 -0.25, %v1684_v42 }
 0x725   :  { %v1939_v45 = vpop.f32.mrb[18].mxu1 }
 0x726   :  { %v1689_v46 = vmul.f32 1.442695, %v3783_v44  ;;  %v1940_v47 = vadd.f32 %v1939_v45, %v1616_v40  ;;  %v4038_v48 = vpop.f32.mrb[19].mxu1  ;;  %v97_v45 = vld [vmem:[#allocation2] sm:$0xff] }
 0x728   :  { %4204 = vpow2.f32 %v1689_v46  ;;  %v3788_v49 = vmul.f32 -0.25, %v1940_v47 }
 0x729   :  { %v2198_v50 = vpop.f32.mrb[20].mxu1 }
 0x72a   :  { %v1945_v51 = vmul.f32 1.442695, %v3788_v49  ;;  %v2199_v52 = vadd.f32 %v2198_v50, %v1616_v40  ;;  %v4053_v55 = vpop.f32.mrb[21].mxu1 }
 0x72c   :  { %4206 = vpow2.f32 %v1945_v51  ;;  %v3793_v56 = vmul.f32 -0.25, %v2199_v52 }
 0x72e   :  { %v2204_v57 = vmul.f32 1.442695, %v3793_v56 }
 0x730   :  { %4208 = vpow2.f32 %v2204_v57 }
 0x732   :  { %v4205_v58 = vpop.eup %4204 }
 0x733   :  { %v1691_v59 = vadd.f32 1.0, %v4205_v58 }
 0x735   :  { %4210 = vrcp.f32 %v1691_v59 }
 0x736   :  { %v4207_v60 = vpop.eup %4206 }
 0x737   :  { %v1947_v61 = vadd.f32 1.0, %v4207_v60 }
 0x739   :  { %4212 = vrcp.f32 %v1947_v61 }
 0x73a   :  { %v4209_v62 = vpop.eup %4208 }
 0x73b   :  { %v2206_v63 = vadd.f32 1.0, %v4209_v62 }
 0x73d   :  { %4214 = vrcp.f32 %v2206_v63 }
 0x73f   :  { %v4211_v2 = vpop.eup %4210 }
 0x740   :  { %1694 = vst.msk [vmem:[#allocation12] sm:$0xff] %vm487_vm3, %v4211_v2  ;;  %1695 = vxpose.xlu0.b32.start.end [1/1] (short) (narrow) %v4211_v2, 8 }
 0x743   :  { %v4213_v4 = vpop.eup %4212 }
 0x744   :  { %1951 = vst.msk [vmem:[#allocation12 + $0x8] sm:$0xff] %vm487_vm3, %v4213_v4  ;;  %2026 = vxpose.xlu1.b32.start.end [1/1] (short) (narrow) %v4213_v4, 8 }
 0x747   :  { %v4215_v7 = vpop.eup %4214 }
 0x748   :  { %2210 = vst.msk [vmem:[#allocation12 + $0x10] sm:$0xff] %vm487_vm3, %v4215_v7 }
 0x7c0   :  { %v1711_v8 = vpop.trf.xlu0 }
 0x7c1   :  { %4027 = vmatmul.mubr.msk.f32.vlgmr.msra.gmra.mrb[20].mxu0 %vm487_vm3, %v1711_v8 }
 0x7c2   :  { %4030 = vmatpush3.msra.mxu0 %v4639_v6  ;;  %4031 = vmatprep.mubr.msk.f32.mxu0 %vm4408_vm4, %v4407_v19 }
 0x7c3   :  { %4039 = vmatprep.subr.mxu0 %v4407_v19 }
 0x7c4   :  { %v2042_v6 = vpop.trf.xlu1 }
 0x7c9   :  { %4032 = vmatmul.mubr.msk.f32.vlgmr.msra.gmra.mrb[20].mxu0 %vm487_vm3, %v4211_v2 }
 0x7ca   :  { %4040 = vmatpush3.msra.mxu0 %v4651_v12  ;;  %4041 = vmatprep.mubr.msk.f32.mxu0 %vm4408_vm4, %v4407_v19 }
 0x7cb   :  { %4044 = vmatprep.subr.mxu0 %v4407_v19 }
 0x7d1   :  { %4042 = vmatmul.mubr.msk.f32.vlgmr.msra.gmra.mrb[20].mxu0 %vm487_vm3, %v4213_v4 }
 0x7d2   :  { %4045 = vmatpush3.msra.mxu0 %v4670_v22  ;;  %4046 = vmatprep.mubr.msk.f32.mxu0 %vm4408_vm4, %v4407_v19 }
 0x7d3   :  { %4054 = vmatprep.subr.mxu0 %v4407_v19 }
 0x7d9   :  { %4047 = vmatmul.mubr.msk.f32.vlgmr.msra.gmra.mrb[20].mxu0 %vm487_vm3, %v2042_v6 }
 0x7da   :  { %4055 = vmatpush3.msra.mxu0 %v4716_v23  ;;  %4056 = vmatprep.mubr.msk.f32.mxu0 %vm4408_vm4, %v4407_v19 }
 0x7db   :  { %4059 = vmatprep.subr.mxu0 %v4407_v19 }
 0x7e1   :  { %4057 = vmatmul.mubr.msk.f32.vlgmr.msra.gmra.mrb[20].mxu0 %vm487_vm3, %v4215_v7 }
 0x7e2   :  { %4060 = vmatpush3.msra.mxu0 %v4682_v29  ;;  %4061 = vmatprep.mubr.msk.f32.mxu0 %vm4408_vm4, %v4407_v19 }
 0x7e3   :  { %4069 = vmatprep.subr.mxu0 %v4407_v19 }
 0x7ed   :  { %v2457_v9 = vpop.f32.mrb[22].mxu1 }
 0x7ee   :  { %v2458_v12 = vadd.f32 %v2457_v9, %v1616_v40  ;;  %v4771_v13 = vpop.f32.mrb[18].mxu0  ;;  %v4068_v14 = vpop.f32.mrb[23].mxu1 }
 0x7ef   :  { %v1607_v15 = vpop.f32.mrb[19].mxu0 }
 0x7f0   :  { %v3798_v18 = vmul.f32 -0.25, %v2458_v12 }
 0x7f1   :  { %v2725_v22 = vpop.f32.mrb[24].mxu1 }
 0x7f2   :  { %v2463_v24 = vmul.f32 1.442695, %v3798_v18  ;;  %v2726_v25 = vadd.f32 %v2725_v22, %v4773_v16  ;;  %v4083_v26 = vpop.f32.mrb[25].mxu1 }
 0x7f4   :  { %4216 = vpow2.f32 %v2463_v24  ;;  %v3803_v29 = vmul.f32 -0.25, %v2726_v25 }
 0x7f6   :  { %v2731_v30 = vmul.f32 1.442695, %v3803_v29 }
 0x7f8   :  { %4218 = vpow2.f32 %v2731_v30 }
 0x7fe   :  { %v4217_v31 = vpop.eup %4216 }
 0x7ff   :  { %v2465_v32 = vadd.f32 1.0, %v4217_v31 }
 0x801   :  { %4220 = vrcp.f32 %v2465_v32 }
 0x802   :  { %v4219_v23 = vpop.eup %4218 }
 0x803   :  { %v2733_v34 = vadd.f32 1.0, %v4219_v23 }
 0x805   :  { %4222 = vrcp.f32 %v2733_v34 }
 0x80b   :  { %v4221_v35 = vpop.eup %4220 }
 0x80c   :  { %2469 = vst.msk [vmem:[#allocation12 + $0x18] sm:$0xff] %vm487_vm3, %v4221_v35  ;;  %2544 = vxpose.xlu1.b32.start.end [1/1] (short) (narrow) %v4221_v35, 8 }
 0x80f   :  { %v4223_v36 = vpop.eup %4222 }
 0x810   :  { %2737 = vst.msk [vmem:[#allocation12 + $0x20] sm:$0xff] %vm487_vm3, %v4223_v36  ;;  %2738 = vxpose.xlu0.b32.start.end [1/1] (short) (narrow) %v4223_v36, 8 }
 0x814   :  { %2285 = vxpose.xlu0.b32.start.end [1/1] (short) (narrow) %v4215_v7, 8 }
 0x890   :  { %v2754_v40 = vpop.trf.xlu0 }
 0x891   :  { %4087 = vmatmul.mubr.msk.f32.vlgmr.msra.gmra.mrb[26].mxu1 %vm487_vm3, %v2754_v40 }
 0x892   :  { %4090 = vmatpush3.msra.mxu1 %v4637_v5  ;;  %4091 = vmatprep.mubr.msk.f32.mxu1 %vm4408_vm4, %v4407_v19 }
 0x893   :  { %4094 = vmatprep.subr.mxu1 %v4407_v19 }
 0x894   :  { %v2301_v41 = vpop.trf.xlu0 }
 0x895   :  { %4062 = vmatmul.mubr.msk.f32.vlgmr.msra.gmra.mrb[20].mxu0 %vm487_vm3, %v2301_v41 }
 0x896   :  { %4070 = vmatpush3.msra.mxu0 %v4734_v39  ;;  %4071 = vmatprep.mubr.msk.f32.mxu0 %vm4408_vm4, %v4407_v19 }
 0x897   :  { %4074 = vmatprep.subr.mxu0 %v4407_v19 }
 0x899   :  { %4092 = vmatmul.mubr.msk.f32.vlgmr.msra.gmra.mrb[26].mxu1 %vm487_vm3, %v4223_v36 }
 0x89a   :  { %4095 = vmatpush3.xpose.msk.msra.mxu1 %vm487_vm3, %v4625_v3  ;;  %4096 = vmatprep.mubr.msk.f32.mxu1 %vm4408_vm4, %v4407_v19  ;;  %v2560_v3 = vpop.trf.xlu1 }
 0x89b   :  { %4099 = vmatprep.subr.mxu1 %v4407_v19 }
 0x89d   :  { %4072 = vmatmul.mubr.msk.f32.vlgmr.msra.gmra.mrb[20].mxu0 %vm487_vm3, %v4221_v35  ;;  %4097 = vmatmul.mubr.msk.f32.vlgmr.msra.gmra.mrb[28].mxu1 %vm487_vm3, %v4641_v10 }
 0x89e   :  { %4075 = vmatpush3.msra.mxu0 %v1607_v15  ;;  %4100 = vmatpush3.msra.mxu1 %v4649_v11 }
 0x89f   :  { %4076 = vmatprep.mubr.msk.f32.mxu0 %vm4408_vm4, %v4407_v19  ;;  %4109 = vmatprep.subr.mxu0 %v4407_v19 }
 0x8a0   :  { %4101 = vmatprep.mubr.msk.f32.mxu1 %vm4408_vm4, %v4407_v19  ;;  %4104 = vmatprep.subr.mxu1 %v4407_v19 }
 0x8a5   :  { %4077 = vmatmul.mubr.msk.f32.vlgmr.msra.gmra.mrb[20].mxu0 %vm487_vm3, %v2560_v3 }
 0x8a6   :  { %4110 = vmatpush3.xpose.msk.msra.mxu0 %vm487_vm3, %v4672_v27  ;;  %4111 = vmatprep.mubr.msk.f32.mxu0 %vm4408_vm4, %v4407_v19 }
 0x8a7   :  { %4124 = vmatprep.subr.mxu0 %v4407_v19 }
 0x8a9   :  { %4112 = vmatmul.mubr.msk.f32.vlgmr.msra.gmra.mrb[22].mxu0 %vm487_vm3, %v4656_v17 }
 0x8aa   :  { %4125 = vmatpush3.xpose.msk.msra.mxu0 %vm487_vm3, %v4687_v33  ;;  %4126 = vmatprep.mubr.msk.f32.mxu0 %vm4408_vm4, %v4407_v19 }
 0x8ad   :  { %4127 = vmatmul.mubr.msk.f32.vlgmr.msra.gmra.mrb[24].mxu0 %vm487_vm3, %v4718_v37 }
 0x970   :  { %v2982_v5 = vpop.f32.mrb[28].mxu1 }
 0x971   :  { %v2983_v10 = vadd.f32 %v2982_v5, %v4773_v16  ;;  %v4098_v11 = vpop.f32.mrb[29].mxu1 }
 0x973   :  { %v3808_v27 = vmul.f32 -0.25, %v2983_v10 }
 0x975   :  { %v2988_v39 = vmul.f32 1.442695, %v3808_v27 }
 0x977   :  { %4224 = vpow2.f32 %v2988_v39 }
 0x978   :  { %v2645_v42 = vpop.f32.mrb[20].mxu0 }
 0x979   :  { %v2650_v17 = vmul.f32 0.17677669, %v2645_v42  ;;  %v4078_v44 = vpop.f32.mrb[21].mxu0 }
 0x97b   :  { %v2651_v33 = vadd.f32 %v2650_v17, %v325_v43 }
 0x97c   :  { %v3241_v46 = vpop.f32.mrb[22].mxu0 }
 0x97d   :  { %v2652_v47 = vadd.f32 %v2651_v33, %v97_v45  ;;  %v3242_v48 = vadd.f32 %v3241_v46, %v4773_v16  ;;  %v4113_v49 = vpop.f32.mrb[23].mxu0 }
 0x97f   :  { %v2653_v37 = vmul.f32 0.5, %v2652_v47  ;;  %v3813_v50 = vmul.f32 -0.25, %v3242_v48 }
 0x980   :  { %v3500_v51 = vpop.f32.mrb[24].mxu0 }
 0x981   :  { %v4225_v52 = vpop.eup %4224  ;;  %v2654_v55 = vadd.f32 %v2653_v37, %v4540_v0  ;;  %v3247_v56 = vmul.f32 1.442695, %v3813_v50  ;;  %v3501_v57 = vadd.f32 %v3500_v51, %v4773_v16  ;;  %v4128_v58 = vpop.f32.mrb[25].mxu0 }
 0x982   :  { %v2990_v54 = vadd.f32 1.0, %v4225_v52 }
 0x983   :  { %v2655_v59 = vmul.f32 0.5, %v2654_v55  ;;  %4226 = vpow2.f32 %v3247_v56  ;;  %v3818_v60 = vmul.f32 -0.25, %v3501_v57 }
 0x984   :  { %4228 = vrcp.f32 %v2990_v54 }
 0x985   :  { %2656 = vst.msk [vmem:[#allocation11] sm:$0xff] %vm99_vm0, %v2655_v59  ;;  %v3506_v61 = vmul.f32 1.442695, %v3818_v60 }
 0x987   :  { %4230 = vpow2.f32 %v3506_v61 }
 0x98d   :  { %v4227_v62 = vpop.eup %4226 }
 0x98e   :  { %v4229_v63 = vpop.eup %4228  ;;  %v3249_v2 = vadd.f32 1.0, %v4227_v62 }
 0x98f   :  { %2994 = vst.msk [vmem:[#allocation12 + $0x28] sm:$0xff] %vm487_vm3, %v4229_v63  ;;  %3069 = vxpose.xlu0.b32.start.end [1/1] (short) (narrow) %v4229_v63, 8  ;;  %4102 = vmatmul.mubr.msk.f32.vlgmr.msra.gmra.mrb[26].mxu1 %vm487_vm3, %v4229_v63 }
 0x990   :  { %4232 = vrcp.f32 %v3249_v2  ;;  %4105 = vmatpush3.msra.mxu1 %v4668_v20  ;;  %4106 = vmatprep.mubr.msk.f32.mxu1 %vm4408_vm4, %v4407_v19 }
 0x991   :  { %v4231_v0 = vpop.eup %4230  ;;  %4114 = vmatprep.subr.mxu1 %v4407_v19 }
 0x992   :  { %v3508_v4 = vadd.f32 1.0, %v4231_v0 }
 0x994   :  { %4234 = vrcp.f32 %v3508_v4 }
 0x99a   :  { %v4233_v7 = vpop.eup %4232 }
 0x99b   :  { %3253 = vst.msk [vmem:[#allocation12 + $0x30] sm:$0xff] %vm487_vm3, %v4233_v7  ;;  %3328 = vxpose.xlu1.b32.start.end [1/1] (short) (narrow) %v4233_v7, 8 }
 0x99e   :  { %v4235_v8 = vpop.eup %4234 }
 0x99f   :  { %3512 = vst.msk [vmem:[#allocation12 + $0x38] sm:$0xff] %vm487_vm3, %v4235_v8  ;;  %3587 = vxpose.xlu0.b32.start.end [1/1] (short) (narrow) %v4235_v8, 8 }
 0xa0f   :  { %v3085_v6 = vpop.trf.xlu0 }
 0xa10   :  { %4107 = vmatmul.mubr.msk.f32.vlgmr.msra.gmra.mrb[26].mxu1 %vm487_vm3, %v3085_v6 }
 0xa11   :  { %4115 = vmatpush3.msra.mxu1 %v4714_v21  ;;  %4116 = vmatprep.mubr.msk.f32.mxu1 %vm4408_vm4, %v4407_v19 }
 0xa12   :  { %4119 = vmatprep.subr.mxu1 %v4407_v19 }
 0xa18   :  { %4117 = vmatmul.mubr.msk.f32.vlgmr.msra.gmra.mrb[26].mxu1 %vm487_vm3, %v4233_v7 }
 0xa19   :  { %4120 = vmatpush3.msra.mxu1 %v4680_v28  ;;  %4121 = vmatprep.mubr.msk.f32.mxu1 %vm4408_vm4, %v4407_v19 }
 0xa1a   :  { %4129 = vmatprep.subr.mxu1 %v4407_v19 }
 0xa1b   :  { %v3344_v20 = vpop.trf.xlu1 }
 0xa1f   :  { %v3603_v28 = vpop.trf.xlu0 }
 0xa20   :  { %4122 = vmatmul.mubr.msk.f32.vlgmr.msra.gmra.mrb[26].mxu1 %vm487_vm3, %v3344_v20 }
 0xa21   :  { %4130 = vmatpush3.msra.mxu1 %v4729_v38  ;;  %4131 = vmatprep.mubr.msk.f32.mxu1 %vm4408_vm4, %v4407_v19 }
 0xa22   :  { %4134 = vmatprep.subr.mxu1 %v4407_v19 }
 0xa28   :  { %4132 = vmatmul.mubr.msk.f32.vlgmr.msra.gmra.mrb[26].mxu1 %vm487_vm3, %v4235_v8 }
 0xa29   :  { %4135 = vmatpush3.msra.mxu1 %v4771_v13  ;;  %4136 = vmatprep.mubr.msk.f32.mxu1 %vm4408_vm4, %v4407_v19 }
 0xa30   :  { %4137 = vmatmul.mubr.msk.f32.vlgmr.msra.gmra.mrb[26].mxu1 %vm487_vm3, %v3603_v28 }
 0xa31   :  { %4357 = shalt.err (!%p4354_p2)
}
 0xa32   :  { %s4358_s22 = scalar_lea.hbm %s4892_s7, 1024 }
 0xa33   :  { %p4359_p3 = scmp.ne.s32.totalorder %s4892_s7, %s4358_s22  ;;  %p4362_p4 = scmp.lt.u32.totalorder %s4358_s22, %s4892_s7 }
 0xa35   :  { %p4364_p5 = pnand %p4362_p4, %p4359_p3 }
 0xa37   :  { %4367 = shalt.err (!%p4364_p5)
}
 0xa38   :  { %3723 = dma.vmem_to_hbm [thread:$0]  %s3718_s18, 1024, %s4892_s7, [#allocation13], %s4402_s13, %s4402_s13, %s4403_s14   ;;  %v326_v21 = vmul.f32 0.17677669, %v4601_v53  ;;  %v98_v12 = vld [vmem:[#allocation2 + $0x8] sm:$0xff] }
 0xa39   :  { %s4410_s28 = smov [#allocation11]  }
 0xa3a   :  { %s3705_s29 = sshll.u32 %s4410_s28, 4  ;;  %s3706_s29 = int_to_ptr.vmem [resolvable:$true] %s3705_s29 }
 0xa3b   :  { %s4368_s8 = scalar_lea.vmem %s3706_s29, 256  ;;  %p4373_p7 = scmp.lt.s32.totalorder %s3706_s29, %s3706_s29 }
 0xa3c   :  { %p4369_p6 = scmp.ne.s32.totalorder %s3706_s29, %s4368_s8  ;;  %p4374_p8 = scmp.lt.s32.totalorder %s4368_s8, %s4368_s8 }
 0xa3e   :  { %p4375_p9 = por %p4374_p8, %p4373_p7 }
 0xa40   :  { %p4376_p10 = pnand %p4375_p9, %p4369_p6 }
 0xb03   :  { %v3688_v19 = vpop.f32.mrb[26].mxu1 }
 0xb04   :  { %v3693_v38 = vmul.f32 0.17677669, %v3688_v19  ;;  %v4138_v9 = vpop.f32.mrb[27].mxu1 }
 0xb06   :  { %v3694_v13 = vadd.f32 %v3693_v38, %v326_v21 }
 0xb08   :  { %v3695_v14 = vadd.f32 %v3694_v13, %v98_v12 }
 0xb0a   :  { %v3696_v15 = vmul.f32 0.5, %v3695_v14 }
 0xb0c   :  { %v3697_v16 = vadd.f32 %v3696_v15, %v4542_v1 }
 0xb0e   :  { %v3698_v18 = vmul.f32 0.5, %v3697_v16 }
 0xb10   :  { %3699 = vst.msk [vmem:[#allocation11 + $0x8] sm:$0xff] %vm99_vm0, %v3698_v18 }
 0xb11   :  { %4379 = shalt.err (!%p4376_p10)
}
 0xb12   :  { %s4380_s10 = scalar_lea.hbm %s4891_s6, 256 }
 0xb13   :  { %p4381_p11 = scmp.ne.s32.totalorder %s4891_s6, %s4380_s10  ;;  %p4384_p12 = scmp.lt.u32.totalorder %s4380_s10, %s4891_s6 }
 0xb15   :  { %p4386_p13 = pnand %p4384_p12, %p4381_p11 }
 0xb17   :  { %4389 = shalt.err (!%p4386_p13)
}
 0xb18   :  { %3711 = dma.vmem_to_hbm [thread:$0]  %s3706_s29, 256, %s4891_s6, [#allocation4], %s4402_s13, %s4402_s13, %s4403_s14  }
 0xb19   :  { %4396 = dma.done.wait [#allocation4], 256  }
 0xb1a   :  { %4397 = vsyncadd [#allocation4], 4294967040 }
 0xb1b   :  { %4398 = dma.done.wait [#allocation13], 1024  }
 0xb1c   :  { %4399 = vsyncadd [#allocation13], 4294966272 }
 0xb1d   :  { %3730 = vsyncpa [#allocation3], 1 }
 0xb1e   :  { %3731 = vsyncpa [#allocation6], 1 }
 0xb1f   :  { %3732 = vsyncpa [#allocation9], 1 }
 0xb20   :  { %3733 = vsyncpa [#allocation4], 1 }
 0xb21   :  { %3734 = vsyncpa [#allocation13], 1 }

</bundles_post_ra>
